<compile_context>
chip_gen: v5e
topology: v5e:2x2
jax: 0.10.0
libtpu: 0.0.40
codegen_flags: <defaults>
</compile_context>

<pallas_src>
import functools

import jax
import jax.numpy as jnp
import numpy as np
from jax import lax
from jax.experimental import pallas as pl
from jax.experimental.pallas import tpu as pltpu


def resblock_kernel(x_ref, coord_ref, w1_ref, g1_ref, b1_ref,
                    w2_ref, g2_ref, b2_ref, out_ref,
                    shift_ref, col_ref,
                    *, N, H, W, C, K, P, margin, eps, mxu_dtype):
    NHW = N * H * W
    hh = coord_ref[0:1, :]            # (1, NHW) int32: h coord of each position
    ww = coord_ref[1:2, :]            # (1, NHW) int32: w coord of each position

    # Zero only the two lane-aligned margins of the shift buffer, once.  The
    # interior is fully overwritten before each conv, so no full-pad zeroing.
    shift_ref[:, 0:margin] = jnp.zeros((C, margin), jnp.float32)
    shift_ref[:, margin + NHW:margin + NHW + margin] = jnp.zeros((C, margin),
                                                                 jnp.float32)

    def _and(a, b):
        return b if a is None else jnp.logical_and(a, b)

    def conv(src, w_ref):
        """'Same' conv of src (C, NHW) with weight slab (C, K*K*C): one MXU dot."""
        shift_ref[:, margin:margin + NHW] = src       # lane-aligned interior write
        for kh in range(K):
            for kw in range(K):
                dh, dw = kh - P, kw - P
                off = dh * W + dw
                # window[:, p] = src[:, p + off]; out-of-image taps masked to 0
                window = shift_ref[:, margin + off:margin + off + NHW]
                valid = None
                if dh > 0:
                    valid = _and(valid, hh < H - dh)
                elif dh < 0:
                    valid = _and(valid, hh >= -dh)
                if dw > 0:
                    valid = _and(valid, ww < W - dw)
                elif dw < 0:
                    valid = _and(valid, ww >= -dw)
                if valid is not None:
                    window = jnp.where(valid, window, 0.0)
                t = kh * K + kw
                col_ref[t * C:(t + 1) * C, :] = window
        patches = col_ref[...].astype(mxu_dtype)      # (K*K*C, NHW)
        return jnp.dot(w_ref[...], patches,
                       preferred_element_type=jnp.float32)   # (C, NHW) f32

    def bn_relu(y, g_ref, b_ref, residual=None):
        # Training-mode BatchNorm folded into one per-channel scale/shift.
        mean = jnp.mean(y, axis=1, keepdims=True)                 # (C, 1)
        var = jnp.mean((y - mean) ** 2, axis=1, keepdims=True)    # biased var
        s = g_ref[...] * lax.rsqrt(var + eps)
        t = b_ref[...] - mean * s
        z = y * s + t
        if residual is not None:
            z = z + residual
        return jnp.maximum(z, 0.0)

    x = x_ref[...]                                    # (C, NHW) f32
    a1 = bn_relu(conv(x, w1_ref), g1_ref, b1_ref)     # conv1 -> bn1 -> relu
    out_ref[...] = bn_relu(conv(a1, w2_ref), g2_ref, b2_ref, residual=x)


def res_block(x_nchw, params, K, *, mxu_dtype=jnp.bfloat16, eps=1e-5):
    """NCHW in / NCHW out wrapper around the fused Pallas resBlock kernel."""
    N, C, H, W = x_nchw.shape
    P = (K - 1) // 2
    assert K % 2 == 1, "torch-style 'same' padding assumed (odd kernel size)"
    NHW = N * H * W
    margin = ((P * W + P + 127) // 128) * 128          # lane-aligned shift margin
    assert margin >= P * W + P

    w1, b1, g1, be1, w2, b2, g2, be2 = params
    assert w1.shape == (C, C, K, K), "residual add requires Cin == Cout"
    del b1, b2   # conv bias is a no-op in front of training-mode BatchNorm

    # channels-major, spatial-in-lanes layout (lane-dense output slab)
    x_flat = jnp.transpose(x_nchw, (1, 0, 2, 3)).reshape(C, NHW).astype(jnp.float32)

    # (h, w) coordinate of every flat spatial position, for the padding masks
    hw = jnp.stack([
        jnp.tile(jnp.repeat(jnp.arange(H, dtype=jnp.int32), W), N),
        jnp.tile(jnp.arange(W, dtype=jnp.int32), N * H),
    ])                                                  # (2, NHW) int32

    def prep_w(w):   # torch OIHW -> (Cout, KH*KW*Cin) im2col weight slab
        return jnp.transpose(w, (0, 2, 3, 1)).reshape(C, K * K * C).astype(mxu_dtype)

    kern = functools.partial(resblock_kernel, N=N, H=H, W=W, C=C, K=K, P=P,
                             margin=margin, eps=eps, mxu_dtype=mxu_dtype)
    vmem = pl.BlockSpec(memory_space=pltpu.MemorySpace.VMEM)

    flops = 2 * 2 * C * (K * K * C) * NHW + 12 * C * NHW
    bytes_accessed = 4 * (2 * C * NHW + 2 * C * K * K * C + 2 * NHW + 4 * C)

    # TODO(synk): for large N*H*W, grid over a spatial axis (parallel for
    # megacore) with a two-pass partial sum/sumsq BatchNorm finalize so batch
    # stats stay global; at this size a single invocation fits VMEM easily.
    out_flat = pl.pallas_call(
        kern,
        out_shape=jax.ShapeDtypeStruct((C, NHW), jnp.float32),
        in_specs=[vmem] * 8,
        out_specs=vmem,
        scratch_shapes=[
            pltpu.VMEM((C, NHW + 2 * margin), jnp.float32),   # flat shift buffer
            pltpu.VMEM((K * K * C, NHW), jnp.float32),        # im2col patch slab
        ],
        compiler_params=pltpu.CompilerParams(vmem_limit_bytes=32 * 1024 * 1024),
        cost_estimate=pl.CostEstimate(flops=flops, transcendentals=2 * C,
                                      bytes_accessed=bytes_accessed),
    )(
        x_flat, hw,
        prep_w(w1), g1.reshape(C, 1).astype(jnp.float32),
        be1.reshape(C, 1).astype(jnp.float32),
        prep_w(w2), g2.reshape(C, 1).astype(jnp.float32),
        be2.reshape(C, 1).astype(jnp.float32),
    )

    # (C, N*H*W) -> (N, C, H, W)
    return jnp.transpose(out_flat.reshape(C, N, H, W), (1, 0, 2, 3))


def ref_forward(x, params, K):
    """Pure-JAX f32 reference (same math as the PyTorch module, with biases)."""
    w1, b1, g1, be1, w2, b2, g2, be2 = params
    P = (K - 1) // 2

    def conv(a, w, b):
        y = lax.conv_general_dilated(
            a, w, (1, 1), [(P, P), (P, P)],
            dimension_numbers=("NCHW", "OIHW", "NCHW"))
        return y + b.reshape(1, -1, 1, 1)

    def bn(y, g, be, eps=1e-5):
        m = jnp.mean(y, axis=(0, 2, 3), keepdims=True)
        v = jnp.mean((y - m) ** 2, axis=(0, 2, 3), keepdims=True)
        return (y - m) / jnp.sqrt(v + eps) * g.reshape(1, -1, 1, 1) \
            + be.reshape(1, -1, 1, 1)

    a = jax.nn.relu(bn(conv(x, w1, b1), g1, be1))
    z = x + bn(conv(a, w2, b2), g2, be2)
    return jax.nn.relu(z)


if __name__ == "__main__":
    N, C, H, W, K = 2, 4, 16, 16, 3   # in_channels == out_channels (residual add)
    key = jax.random.PRNGKey(0)
    keys = jax.random.split(key, 5)

    scale = 1.0 / np.sqrt(C * K * K)  # torch Conv2d default init bound
    w1 = jax.random.uniform(keys[0], (C, C, K, K), jnp.float32, -scale, scale)
    b1 = jax.random.uniform(keys[1], (C,), jnp.float32, -scale, scale)
    w2 = jax.random.uniform(keys[2], (C, C, K, K), jnp.float32, -scale, scale)
    b2 = jax.random.uniform(keys[3], (C,), jnp.float32, -scale, scale)
    g1 = jnp.ones((C,), jnp.float32)
    be1 = jnp.zeros((C,), jnp.float32)
    g2 = jnp.ones((C,), jnp.float32)
    be2 = jnp.zeros((C,), jnp.float32)
    params = (w1, b1, g1, be1, w2, b2, g2, be2)

    x = jax.random.normal(keys[4], (N, C, H, W), jnp.float32)
    ref = jax.block_until_ready(ref_forward(x, params, K))

    # Tight correctness check with f32 MXU operands.
    out_f32 = jax.block_until_ready(res_block(x, params, K, mxu_dtype=jnp.float32))
    assert out_f32.shape == (N, C, H, W)
    np.testing.assert_allclose(np.asarray(out_f32), np.asarray(ref),
                               atol=2e-3, rtol=2e-3)

    # Default bf16 MXU operands (v6e/v7x fast path): two chained bf16 convs +
    # BatchNorm vs the f32 reference -> looser tolerance.
    out_bf16 = jax.block_until_ready(res_block(x, params, K))
    assert out_bf16.shape == (N, C, H, W)
    np.testing.assert_allclose(np.asarray(out_bf16), np.asarray(ref),
                               atol=5e-2, rtol=5e-2)

    print("KERNEL_OK")
</pallas_src>

<mosaic_0001>
module attributes {stable_mosaic.version = 11 : i64} {
  func.func @resblock_kernel(%arg0: memref<4x512xf32, #tpu.memory_space<vmem>>, %arg1: memref<2x512xi32, #tpu.memory_space<vmem>>, %arg2: memref<4x36xf32, #tpu.memory_space<vmem>>, %arg3: memref<4x1xf32, #tpu.memory_space<vmem>>, %arg4: memref<4x1xf32, #tpu.memory_space<vmem>>, %arg5: memref<4x36xf32, #tpu.memory_space<vmem>>, %arg6: memref<4x1xf32, #tpu.memory_space<vmem>>, %arg7: memref<4x1xf32, #tpu.memory_space<vmem>>, %arg8: memref<4x512xf32, #tpu.memory_space<vmem>>, %arg9: memref<4x768xf32, #tpu.memory_space<vmem>>, %arg10: memref<36x512xf32, #tpu.memory_space<vmem>>) attributes {dimension_semantics = [], scalar_prefetch = 0 : i64, scratch_operands = 2 : i64, tpu.core_type = #tpu.core_type<tc>} {
    %c0 = arith.constant 0 : index
    %c0_0 = arith.constant 0 : index
    %0 = vector.load %arg1[%c0, %c0_0] : memref<2x512xi32, #tpu.memory_space<vmem>>, vector<1x512xi32>
    %c1 = arith.constant 1 : index
    %c0_1 = arith.constant 0 : index
    %1 = vector.load %arg1[%c1, %c0_1] : memref<2x512xi32, #tpu.memory_space<vmem>>, vector<1x512xi32>
    %cst = arith.constant 0.000000e+00 : f32
    %2 = vector.broadcast %cst : f32 to vector<4x128xf32>
    %c0_2 = arith.constant 0 : index
    %c0_3 = arith.constant 0 : index
    %3 = vector.load %arg9[%c0_2, %c0_3] : memref<4x768xf32, #tpu.memory_space<vmem>>, vector<4x128xf32>
    tpu.vector_store %arg9[%c0_2, %c0_3], %2 {strides = array<i32>} : memref<4x768xf32, #tpu.memory_space<vmem>>, vector<4x128xf32>,
    %cst_4 = arith.constant 0.000000e+00 : f32
    %4 = vector.broadcast %cst_4 : f32 to vector<4x128xf32>
    %c0_5 = arith.constant 0 : index
    %c640 = arith.constant 640 : index
    %5 = vector.load %arg9[%c0_5, %c640] : memref<4x768xf32, #tpu.memory_space<vmem>>, vector<4x128xf32>
    tpu.vector_store %arg9[%c0_5, %c640], %4 {strides = array<i32>} : memref<4x768xf32, #tpu.memory_space<vmem>>, vector<4x128xf32>,
    %c0_6 = arith.constant 0 : index
    %c0_7 = arith.constant 0 : index
    %6 = vector.load %arg0[%c0_6, %c0_7] : memref<4x512xf32, #tpu.memory_space<vmem>>, vector<4x512xf32>
    %c0_8 = arith.constant 0 : index
    %c128 = arith.constant 128 : index
    %7 = vector.load %arg9[%c0_8, %c128] : memref<4x768xf32, #tpu.memory_space<vmem>>, vector<4x512xf32>
    tpu.vector_store %arg9[%c0_8, %c128], %6 {strides = array<i32>} : memref<4x768xf32, #tpu.memory_space<vmem>>, vector<4x512xf32>,
    %c0_9 = arith.constant 0 : index
    %c111 = arith.constant 111 : index
    %8 = vector.load %arg9[%c0_9, %c111] : memref<4x768xf32, #tpu.memory_space<vmem>>, vector<4x512xf32>
    %c1_i32 = arith.constant 1 : i32
    %9 = vector.broadcast %c1_i32 : i32 to vector<1x512xi32>
    %10 = arith.cmpi sge, %0, %9 : vector<1x512xi32>
    %c1_i32_10 = arith.constant 1 : i32
    %11 = vector.broadcast %c1_i32_10 : i32 to vector<1x512xi32>
    %12 = arith.cmpi sge, %1, %11 : vector<1x512xi32>
    %13 = arith.andi %10, %12 : vector<1x512xi1>
    %cst_11 = arith.constant 0.000000e+00 : f32
    %14 = vector.shape_cast %13 : vector<1x512xi1> to vector<1x512xi1>
    %15 = vector.broadcast %14 : vector<1x512xi1> to vector<4x512xi1>
    %16 = vector.broadcast %cst_11 : f32 to vector<4x512xf32>
    %17 = arith.select %15, %8, %16 : vector<4x512xi1>, vector<4x512xf32>
    %c0_12 = arith.constant 0 : index
    %c0_13 = arith.constant 0 : index
    %18 = vector.load %arg10[%c0_12, %c0_13] : memref<36x512xf32, #tpu.memory_space<vmem>>, vector<4x512xf32>
    tpu.vector_store %arg10[%c0_12, %c0_13], %17 {strides = array<i32>} : memref<36x512xf32, #tpu.memory_space<vmem>>, vector<4x512xf32>,
    %c0_14 = arith.constant 0 : index
    %c112 = arith.constant 112 : index
    %19 = vector.load %arg9[%c0_14, %c112] : memref<4x768xf32, #tpu.memory_space<vmem>>, vector<4x512xf32>
    %c1_i32_15 = arith.constant 1 : i32
    %20 = vector.broadcast %c1_i32_15 : i32 to vector<1x512xi32>
    %21 = arith.cmpi sge, %0, %20 : vector<1x512xi32>
    %cst_16 = arith.constant 0.000000e+00 : f32
    %22 = vector.shape_cast %21 : vector<1x512xi1> to vector<1x512xi1>
    %23 = vector.broadcast %22 : vector<1x512xi1> to vector<4x512xi1>
    %24 = vector.broadcast %cst_16 : f32 to vector<4x512xf32>
    %25 = arith.select %23, %19, %24 : vector<4x512xi1>, vector<4x512xf32>
    %c4 = arith.constant 4 : index
    %c0_17 = arith.constant 0 : index
    %26 = vector.load %arg10[%c4, %c0_17] : memref<36x512xf32, #tpu.memory_space<vmem>>, vector<4x512xf32>
    tpu.vector_store %arg10[%c4, %c0_17], %25 {strides = array<i32>} : memref<36x512xf32, #tpu.memory_space<vmem>>, vector<4x512xf32>,
    %c0_18 = arith.constant 0 : index
    %c113 = arith.constant 113 : index
    %27 = vector.load %arg9[%c0_18, %c113] : memref<4x768xf32, #tpu.memory_space<vmem>>, vector<4x512xf32>
    %c1_i32_19 = arith.constant 1 : i32
    %28 = vector.broadcast %c1_i32_19 : i32 to vector<1x512xi32>
    %29 = arith.cmpi sge, %0, %28 : vector<1x512xi32>
    %c15_i32 = arith.constant 15 : i32
    %30 = vector.broadcast %c15_i32 : i32 to vector<1x512xi32>
    %31 = arith.cmpi slt, %1, %30 : vector<1x512xi32>
    %32 = arith.andi %29, %31 : vector<1x512xi1>
    %cst_20 = arith.constant 0.000000e+00 : f32
    %33 = vector.shape_cast %32 : vector<1x512xi1> to vector<1x512xi1>
    %34 = vector.broadcast %33 : vector<1x512xi1> to vector<4x512xi1>
    %35 = vector.broadcast %cst_20 : f32 to vector<4x512xf32>
    %36 = arith.select %34, %27, %35 : vector<4x512xi1>, vector<4x512xf32>
    %c8 = arith.constant 8 : index
    %c0_21 = arith.constant 0 : index
    %37 = vector.load %arg10[%c8, %c0_21] : memref<36x512xf32, #tpu.memory_space<vmem>>, vector<4x512xf32>
    tpu.vector_store %arg10[%c8, %c0_21], %36 {strides = array<i32>} : memref<36x512xf32, #tpu.memory_space<vmem>>, vector<4x512xf32>,
    %c0_22 = arith.constant 0 : index
    %c127 = arith.constant 127 : index
    %38 = vector.load %arg9[%c0_22, %c127] : memref<4x768xf32, #tpu.memory_space<vmem>>, vector<4x512xf32>
    %c1_i32_23 = arith.constant 1 : i32
    %39 = vector.broadcast %c1_i32_23 : i32 to vector<1x512xi32>
    %40 = arith.cmpi sge, %1, %39 : vector<1x512xi32>
    %cst_24 = arith.constant 0.000000e+00 : f32
    %41 = vector.shape_cast %40 : vector<1x512xi1> to vector<1x512xi1>
    %42 = vector.broadcast %41 : vector<1x512xi1> to vector<4x512xi1>
    %43 = vector.broadcast %cst_24 : f32 to vector<4x512xf32>
    %44 = arith.select %42, %38, %43 : vector<4x512xi1>, vector<4x512xf32>
    %c12 = arith.constant 12 : index
    %c0_25 = arith.constant 0 : index
    %45 = vector.load %arg10[%c12, %c0_25] : memref<36x512xf32, #tpu.memory_space<vmem>>, vector<4x512xf32>
    tpu.vector_store %arg10[%c12, %c0_25], %44 {strides = array<i32>} : memref<36x512xf32, #tpu.memory_space<vmem>>, vector<4x512xf32>,
    %c0_26 = arith.constant 0 : index
    %c128_27 = arith.constant 128 : index
    %46 = vector.load %arg9[%c0_26, %c128_27] : memref<4x768xf32, #tpu.memory_space<vmem>>, vector<4x512xf32>
    %c16 = arith.constant 16 : index
    %c0_28 = arith.constant 0 : index
    %47 = vector.load %arg10[%c16, %c0_28] : memref<36x512xf32, #tpu.memory_space<vmem>>, vector<4x512xf32>
    tpu.vector_store %arg10[%c16, %c0_28], %46 {strides = array<i32>} : memref<36x512xf32, #tpu.memory_space<vmem>>, vector<4x512xf32>,
    %c0_29 = arith.constant 0 : index
    %c129 = arith.constant 129 : index
    %48 = vector.load %arg9[%c0_29, %c129] : memref<4x768xf32, #tpu.memory_space<vmem>>, vector<4x512xf32>
    %c15_i32_30 = arith.constant 15 : i32
    %49 = vector.broadcast %c15_i32_30 : i32 to vector<1x512xi32>
    %50 = arith.cmpi slt, %1, %49 : vector<1x512xi32>
    %cst_31 = arith.constant 0.000000e+00 : f32
    %51 = vector.shape_cast %50 : vector<1x512xi1> to vector<1x512xi1>
    %52 = vector.broadcast %51 : vector<1x512xi1> to vector<4x512xi1>
    %53 = vector.broadcast %cst_31 : f32 to vector<4x512xf32>
    %54 = arith.select %52, %48, %53 : vector<4x512xi1>, vector<4x512xf32>
    %c20 = arith.constant 20 : index
    %c0_32 = arith.constant 0 : index
    %55 = vector.load %arg10[%c20, %c0_32] : memref<36x512xf32, #tpu.memory_space<vmem>>, vector<4x512xf32>
    tpu.vector_store %arg10[%c20, %c0_32], %54 {strides = array<i32>} : memref<36x512xf32, #tpu.memory_space<vmem>>, vector<4x512xf32>,
    %c0_33 = arith.constant 0 : index
    %c143 = arith.constant 143 : index
    %56 = vector.load %arg9[%c0_33, %c143] : memref<4x768xf32, #tpu.memory_space<vmem>>, vector<4x512xf32>
    %c15_i32_34 = arith.constant 15 : i32
    %57 = vector.broadcast %c15_i32_34 : i32 to vector<1x512xi32>
    %58 = arith.cmpi slt, %0, %57 : vector<1x512xi32>
    %c1_i32_35 = arith.constant 1 : i32
    %59 = vector.broadcast %c1_i32_35 : i32 to vector<1x512xi32>
    %60 = arith.cmpi sge, %1, %59 : vector<1x512xi32>
    %61 = arith.andi %58, %60 : vector<1x512xi1>
    %cst_36 = arith.constant 0.000000e+00 : f32
    %62 = vector.shape_cast %61 : vector<1x512xi1> to vector<1x512xi1>
    %63 = vector.broadcast %62 : vector<1x512xi1> to vector<4x512xi1>
    %64 = vector.broadcast %cst_36 : f32 to vector<4x512xf32>
    %65 = arith.select %63, %56, %64 : vector<4x512xi1>, vector<4x512xf32>
    %c24 = arith.constant 24 : index
    %c0_37 = arith.constant 0 : index
    %66 = vector.load %arg10[%c24, %c0_37] : memref<36x512xf32, #tpu.memory_space<vmem>>, vector<4x512xf32>
    tpu.vector_store %arg10[%c24, %c0_37], %65 {strides = array<i32>} : memref<36x512xf32, #tpu.memory_space<vmem>>, vector<4x512xf32>,
    %c0_38 = arith.constant 0 : index
    %c144 = arith.constant 144 : index
    %67 = vector.load %arg9[%c0_38, %c144] : memref<4x768xf32, #tpu.memory_space<vmem>>, vector<4x512xf32>
    %c15_i32_39 = arith.constant 15 : i32
    %68 = vector.broadcast %c15_i32_39 : i32 to vector<1x512xi32>
    %69 = arith.cmpi slt, %0, %68 : vector<1x512xi32>
    %cst_40 = arith.constant 0.000000e+00 : f32
    %70 = vector.shape_cast %69 : vector<1x512xi1> to vector<1x512xi1>
    %71 = vector.broadcast %70 : vector<1x512xi1> to vector<4x512xi1>
    %72 = vector.broadcast %cst_40 : f32 to vector<4x512xf32>
    %73 = arith.select %71, %67, %72 : vector<4x512xi1>, vector<4x512xf32>
    %c28 = arith.constant 28 : index
    %c0_41 = arith.constant 0 : index
    %74 = vector.load %arg10[%c28, %c0_41] : memref<36x512xf32, #tpu.memory_space<vmem>>, vector<4x512xf32>
    tpu.vector_store %arg10[%c28, %c0_41], %73 {strides = array<i32>} : memref<36x512xf32, #tpu.memory_space<vmem>>, vector<4x512xf32>,
    %c0_42 = arith.constant 0 : index
    %c145 = arith.constant 145 : index
    %75 = vector.load %arg9[%c0_42, %c145] : memref<4x768xf32, #tpu.memory_space<vmem>>, vector<4x512xf32>
    %c15_i32_43 = arith.constant 15 : i32
    %76 = vector.broadcast %c15_i32_43 : i32 to vector<1x512xi32>
    %77 = arith.cmpi slt, %0, %76 : vector<1x512xi32>
    %c15_i32_44 = arith.constant 15 : i32
    %78 = vector.broadcast %c15_i32_44 : i32 to vector<1x512xi32>
    %79 = arith.cmpi slt, %1, %78 : vector<1x512xi32>
    %80 = arith.andi %77, %79 : vector<1x512xi1>
    %cst_45 = arith.constant 0.000000e+00 : f32
    %81 = vector.shape_cast %80 : vector<1x512xi1> to vector<1x512xi1>
    %82 = vector.broadcast %81 : vector<1x512xi1> to vector<4x512xi1>
    %83 = vector.broadcast %cst_45 : f32 to vector<4x512xf32>
    %84 = arith.select %82, %75, %83 : vector<4x512xi1>, vector<4x512xf32>
    %c32 = arith.constant 32 : index
    %c0_46 = arith.constant 0 : index
    %85 = vector.load %arg10[%c32, %c0_46] : memref<36x512xf32, #tpu.memory_space<vmem>>, vector<4x512xf32>
    tpu.vector_store %arg10[%c32, %c0_46], %84 {strides = array<i32>} : memref<36x512xf32, #tpu.memory_space<vmem>>, vector<4x512xf32>,
    %c0_47 = arith.constant 0 : index
    %c0_48 = arith.constant 0 : index
    %86 = vector.load %arg10[%c0_47, %c0_48] : memref<36x512xf32, #tpu.memory_space<vmem>>, vector<36x512xf32>
    %c0_49 = arith.constant 0 : index
    %c0_50 = arith.constant 0 : index
    %87 = vector.load %arg2[%c0_49, %c0_50] : memref<4x36xf32, #tpu.memory_space<vmem>>, vector<4x36xf32>
    %cst_51 = arith.constant dense<0.000000e+00> : vector<4x512xf32>
    %88 = tpu.matmul %87, %86, %cst_51 {dimension_numbers = #tpu.dot_dimension_numbers<[1], [0], [0], [1], [0, 0, 1, 1], [], []>} : vector<4x36xf32>, vector<36x512xf32>, vector<4x512xf32> -> vector<4x512xf32>
    %cst_52 = arith.constant dense<0.000000e+00> : vector<4xf32>
    %89 = vector.multi_reduction <add>, %88, %cst_52 [1] : vector<4x512xf32> to vector<4xf32>
    %90 = vector.shape_cast %89 : vector<4xf32> to vector<4x1xf32>
    %cst_53 = arith.constant 5.120000e+02 : f32
    %91 = vector.broadcast %cst_53 : f32 to vector<4x1xf32>
    %92 = arith.divf %90, %91 : vector<4x1xf32>
    %93 = vector.broadcast %92 : vector<4x1xf32> to vector<4x512xf32>
    %94 = arith.subf %88, %93 : vector<4x512xf32>
    %95 = arith.mulf %94, %94 : vector<4x512xf32>
    %cst_54 = arith.constant dense<0.000000e+00> : vector<4xf32>
    %96 = vector.multi_reduction <add>, %95, %cst_54 [1] : vector<4x512xf32> to vector<4xf32>
    %97 = vector.shape_cast %96 : vector<4xf32> to vector<4x1xf32>
    %cst_55 = arith.constant 5.120000e+02 : f32
    %98 = vector.broadcast %cst_55 : f32 to vector<4x1xf32>
    %99 = arith.divf %97, %98 : vector<4x1xf32>
    %c0_56 = arith.constant 0 : index
    %c0_57 = arith.constant 0 : index
    %100 = vector.load %arg3[%c0_56, %c0_57] : memref<4x1xf32, #tpu.memory_space<vmem>>, vector<4x1xf32>
    %cst_58 = arith.constant 9.99999974E-6 : f32
    %101 = vector.broadcast %cst_58 : f32 to vector<4x1xf32>
    %102 = arith.addf %99, %101 : vector<4x1xf32>
    %103 = math.rsqrt %102 : vector<4x1xf32>
    %104 = arith.mulf %100, %103 : vector<4x1xf32>
    %c0_59 = arith.constant 0 : index
    %c0_60 = arith.constant 0 : index
    %105 = vector.load %arg4[%c0_59, %c0_60] : memref<4x1xf32, #tpu.memory_space<vmem>>, vector<4x1xf32>
    %106 = arith.mulf %92, %104 : vector<4x1xf32>
    %107 = arith.subf %105, %106 : vector<4x1xf32>
    %108 = vector.broadcast %104 : vector<4x1xf32> to vector<4x512xf32>
    %109 = arith.mulf %88, %108 : vector<4x512xf32>
    %110 = vector.broadcast %107 : vector<4x1xf32> to vector<4x512xf32>
    %111 = arith.addf %109, %110 : vector<4x512xf32>
    %cst_61 = arith.constant 0.000000e+00 : f32
    %112 = vector.broadcast %cst_61 : f32 to vector<4x512xf32>
    %113 = arith.maximumf %111, %112 : vector<4x512xf32>
    %c0_62 = arith.constant 0 : index
    %c128_63 = arith.constant 128 : index
    %114 = vector.load %arg9[%c0_62, %c128_63] : memref<4x768xf32, #tpu.memory_space<vmem>>, vector<4x512xf32>
    tpu.vector_store %arg9[%c0_62, %c128_63], %113 {strides = array<i32>} : memref<4x768xf32, #tpu.memory_space<vmem>>, vector<4x512xf32>,
    %c0_64 = arith.constant 0 : index
    %c111_65 = arith.constant 111 : index
    %115 = vector.load %arg9[%c0_64, %c111_65] : memref<4x768xf32, #tpu.memory_space<vmem>>, vector<4x512xf32>
    %c1_i32_66 = arith.constant 1 : i32
    %116 = vector.broadcast %c1_i32_66 : i32 to vector<1x512xi32>
    %117 = arith.cmpi sge, %0, %116 : vector<1x512xi32>
    %c1_i32_67 = arith.constant 1 : i32
    %118 = vector.broadcast %c1_i32_67 : i32 to vector<1x512xi32>
    %119 = arith.cmpi sge, %1, %118 : vector<1x512xi32>
    %120 = arith.andi %117, %119 : vector<1x512xi1>
    %cst_68 = arith.constant 0.000000e+00 : f32
    %121 = vector.shape_cast %120 : vector<1x512xi1> to vector<1x512xi1>
    %122 = vector.broadcast %121 : vector<1x512xi1> to vector<4x512xi1>
    %123 = vector.broadcast %cst_68 : f32 to vector<4x512xf32>
    %124 = arith.select %122, %115, %123 : vector<4x512xi1>, vector<4x512xf32>
    %c0_69 = arith.constant 0 : index
    %c0_70 = arith.constant 0 : index
    %125 = vector.load %arg10[%c0_69, %c0_70] : memref<36x512xf32, #tpu.memory_space<vmem>>, vector<4x512xf32>
    tpu.vector_store %arg10[%c0_69, %c0_70], %124 {strides = array<i32>} : memref<36x512xf32, #tpu.memory_space<vmem>>, vector<4x512xf32>,
    %c0_71 = arith.constant 0 : index
    %c112_72 = arith.constant 112 : index
    %126 = vector.load %arg9[%c0_71, %c112_72] : memref<4x768xf32, #tpu.memory_space<vmem>>, vector<4x512xf32>
    %c1_i32_73 = arith.constant 1 : i32
    %127 = vector.broadcast %c1_i32_73 : i32 to vector<1x512xi32>
    %128 = arith.cmpi sge, %0, %127 : vector<1x512xi32>
    %cst_74 = arith.constant 0.000000e+00 : f32
    %129 = vector.shape_cast %128 : vector<1x512xi1> to vector<1x512xi1>
    %130 = vector.broadcast %129 : vector<1x512xi1> to vector<4x512xi1>
    %131 = vector.broadcast %cst_74 : f32 to vector<4x512xf32>
    %132 = arith.select %130, %126, %131 : vector<4x512xi1>, vector<4x512xf32>
    %c4_75 = arith.constant 4 : index
    %c0_76 = arith.constant 0 : index
    %133 = vector.load %arg10[%c4_75, %c0_76] : memref<36x512xf32, #tpu.memory_space<vmem>>, vector<4x512xf32>
    tpu.vector_store %arg10[%c4_75, %c0_76], %132 {strides = array<i32>} : memref<36x512xf32, #tpu.memory_space<vmem>>, vector<4x512xf32>,
    %c0_77 = arith.constant 0 : index
    %c113_78 = arith.constant 113 : index
    %134 = vector.load %arg9[%c0_77, %c113_78] : memref<4x768xf32, #tpu.memory_space<vmem>>, vector<4x512xf32>
    %c1_i32_79 = arith.constant 1 : i32
    %135 = vector.broadcast %c1_i32_79 : i32 to vector<1x512xi32>
    %136 = arith.cmpi sge, %0, %135 : vector<1x512xi32>
    %c15_i32_80 = arith.constant 15 : i32
    %137 = vector.broadcast %c15_i32_80 : i32 to vector<1x512xi32>
    %138 = arith.cmpi slt, %1, %137 : vector<1x512xi32>
    %139 = arith.andi %136, %138 : vector<1x512xi1>
    %cst_81 = arith.constant 0.000000e+00 : f32
    %140 = vector.shape_cast %139 : vector<1x512xi1> to vector<1x512xi1>
    %141 = vector.broadcast %140 : vector<1x512xi1> to vector<4x512xi1>
    %142 = vector.broadcast %cst_81 : f32 to vector<4x512xf32>
    %143 = arith.select %141, %134, %142 : vector<4x512xi1>, vector<4x512xf32>
    %c8_82 = arith.constant 8 : index
    %c0_83 = arith.constant 0 : index
    %144 = vector.load %arg10[%c8_82, %c0_83] : memref<36x512xf32, #tpu.memory_space<vmem>>, vector<4x512xf32>
    tpu.vector_store %arg10[%c8_82, %c0_83], %143 {strides = array<i32>} : memref<36x512xf32, #tpu.memory_space<vmem>>, vector<4x512xf32>,
    %c0_84 = arith.constant 0 : index
    %c127_85 = arith.constant 127 : index
    %145 = vector.load %arg9[%c0_84, %c127_85] : memref<4x768xf32, #tpu.memory_space<vmem>>, vector<4x512xf32>
    %c1_i32_86 = arith.constant 1 : i32
    %146 = vector.broadcast %c1_i32_86 : i32 to vector<1x512xi32>
    %147 = arith.cmpi sge, %1, %146 : vector<1x512xi32>
    %cst_87 = arith.constant 0.000000e+00 : f32
    %148 = vector.shape_cast %147 : vector<1x512xi1> to vector<1x512xi1>
    %149 = vector.broadcast %148 : vector<1x512xi1> to vector<4x512xi1>
    %150 = vector.broadcast %cst_87 : f32 to vector<4x512xf32>
    %151 = arith.select %149, %145, %150 : vector<4x512xi1>, vector<4x512xf32>
    %c12_88 = arith.constant 12 : index
    %c0_89 = arith.constant 0 : index
    %152 = vector.load %arg10[%c12_88, %c0_89] : memref<36x512xf32, #tpu.memory_space<vmem>>, vector<4x512xf32>
    tpu.vector_store %arg10[%c12_88, %c0_89], %151 {strides = array<i32>} : memref<36x512xf32, #tpu.memory_space<vmem>>, vector<4x512xf32>,
    %c0_90 = arith.constant 0 : index
    %c128_91 = arith.constant 128 : index
    %153 = vector.load %arg9[%c0_90, %c128_91] : memref<4x768xf32, #tpu.memory_space<vmem>>, vector<4x512xf32>
    %c16_92 = arith.constant 16 : index
    %c0_93 = arith.constant 0 : index
    %154 = vector.load %arg10[%c16_92, %c0_93] : memref<36x512xf32, #tpu.memory_space<vmem>>, vector<4x512xf32>
    tpu.vector_store %arg10[%c16_92, %c0_93], %153 {strides = array<i32>} : memref<36x512xf32, #tpu.memory_space<vmem>>, vector<4x512xf32>,
    %c0_94 = arith.constant 0 : index
    %c129_95 = arith.constant 129 : index
    %155 = vector.load %arg9[%c0_94, %c129_95] : memref<4x768xf32, #tpu.memory_space<vmem>>, vector<4x512xf32>
    %c15_i32_96 = arith.constant 15 : i32
    %156 = vector.broadcast %c15_i32_96 : i32 to vector<1x512xi32>
    %157 = arith.cmpi slt, %1, %156 : vector<1x512xi32>
    %cst_97 = arith.constant 0.000000e+00 : f32
    %158 = vector.shape_cast %157 : vector<1x512xi1> to vector<1x512xi1>
    %159 = vector.broadcast %158 : vector<1x512xi1> to vector<4x512xi1>
    %160 = vector.broadcast %cst_97 : f32 to vector<4x512xf32>
    %161 = arith.select %159, %155, %160 : vector<4x512xi1>, vector<4x512xf32>
    %c20_98 = arith.constant 20 : index
    %c0_99 = arith.constant 0 : index
    %162 = vector.load %arg10[%c20_98, %c0_99] : memref<36x512xf32, #tpu.memory_space<vmem>>, vector<4x512xf32>
    tpu.vector_store %arg10[%c20_98, %c0_99], %161 {strides = array<i32>} : memref<36x512xf32, #tpu.memory_space<vmem>>, vector<4x512xf32>,
    %c0_100 = arith.constant 0 : index
    %c143_101 = arith.constant 143 : index
    %163 = vector.load %arg9[%c0_100, %c143_101] : memref<4x768xf32, #tpu.memory_space<vmem>>, vector<4x512xf32>
    %c15_i32_102 = arith.constant 15 : i32
    %164 = vector.broadcast %c15_i32_102 : i32 to vector<1x512xi32>
    %165 = arith.cmpi slt, %0, %164 : vector<1x512xi32>
    %c1_i32_103 = arith.constant 1 : i32
    %166 = vector.broadcast %c1_i32_103 : i32 to vector<1x512xi32>
    %167 = arith.cmpi sge, %1, %166 : vector<1x512xi32>
    %168 = arith.andi %165, %167 : vector<1x512xi1>
    %cst_104 = arith.constant 0.000000e+00 : f32
    %169 = vector.shape_cast %168 : vector<1x512xi1> to vector<1x512xi1>
    %170 = vector.broadcast %169 : vector<1x512xi1> to vector<4x512xi1>
    %171 = vector.broadcast %cst_104 : f32 to vector<4x512xf32>
    %172 = arith.select %170, %163, %171 : vector<4x512xi1>, vector<4x512xf32>
    %c24_105 = arith.constant 24 : index
    %c0_106 = arith.constant 0 : index
    %173 = vector.load %arg10[%c24_105, %c0_106] : memref<36x512xf32, #tpu.memory_space<vmem>>, vector<4x512xf32>
    tpu.vector_store %arg10[%c24_105, %c0_106], %172 {strides = array<i32>} : memref<36x512xf32, #tpu.memory_space<vmem>>, vector<4x512xf32>,
    %c0_107 = arith.constant 0 : index
    %c144_108 = arith.constant 144 : index
    %174 = vector.load %arg9[%c0_107, %c144_108] : memref<4x768xf32, #tpu.memory_space<vmem>>, vector<4x512xf32>
    %c15_i32_109 = arith.constant 15 : i32
    %175 = vector.broadcast %c15_i32_109 : i32 to vector<1x512xi32>
    %176 = arith.cmpi slt, %0, %175 : vector<1x512xi32>
    %cst_110 = arith.constant 0.000000e+00 : f32
    %177 = vector.shape_cast %176 : vector<1x512xi1> to vector<1x512xi1>
    %178 = vector.broadcast %177 : vector<1x512xi1> to vector<4x512xi1>
    %179 = vector.broadcast %cst_110 : f32 to vector<4x512xf32>
    %180 = arith.select %178, %174, %179 : vector<4x512xi1>, vector<4x512xf32>
    %c28_111 = arith.constant 28 : index
    %c0_112 = arith.constant 0 : index
    %181 = vector.load %arg10[%c28_111, %c0_112] : memref<36x512xf32, #tpu.memory_space<vmem>>, vector<4x512xf32>
    tpu.vector_store %arg10[%c28_111, %c0_112], %180 {strides = array<i32>} : memref<36x512xf32, #tpu.memory_space<vmem>>, vector<4x512xf32>,
    %c0_113 = arith.constant 0 : index
    %c145_114 = arith.constant 145 : index
    %182 = vector.load %arg9[%c0_113, %c145_114] : memref<4x768xf32, #tpu.memory_space<vmem>>, vector<4x512xf32>
    %c15_i32_115 = arith.constant 15 : i32
    %183 = vector.broadcast %c15_i32_115 : i32 to vector<1x512xi32>
    %184 = arith.cmpi slt, %0, %183 : vector<1x512xi32>
    %c15_i32_116 = arith.constant 15 : i32
    %185 = vector.broadcast %c15_i32_116 : i32 to vector<1x512xi32>
    %186 = arith.cmpi slt, %1, %185 : vector<1x512xi32>
    %187 = arith.andi %184, %186 : vector<1x512xi1>
    %cst_117 = arith.constant 0.000000e+00 : f32
    %188 = vector.shape_cast %187 : vector<1x512xi1> to vector<1x512xi1>
    %189 = vector.broadcast %188 : vector<1x512xi1> to vector<4x512xi1>
    %190 = vector.broadcast %cst_117 : f32 to vector<4x512xf32>
    %191 = arith.select %189, %182, %190 : vector<4x512xi1>, vector<4x512xf32>
    %c32_118 = arith.constant 32 : index
    %c0_119 = arith.constant 0 : index
    %192 = vector.load %arg10[%c32_118, %c0_119] : memref<36x512xf32, #tpu.memory_space<vmem>>, vector<4x512xf32>
    tpu.vector_store %arg10[%c32_118, %c0_119], %191 {strides = array<i32>} : memref<36x512xf32, #tpu.memory_space<vmem>>, vector<4x512xf32>,
    %c0_120 = arith.constant 0 : index
    %c0_121 = arith.constant 0 : index
    %193 = vector.load %arg10[%c0_120, %c0_121] : memref<36x512xf32, #tpu.memory_space<vmem>>, vector<36x512xf32>
    %c0_122 = arith.constant 0 : index
    %c0_123 = arith.constant 0 : index
    %194 = vector.load %arg5[%c0_122, %c0_123] : memref<4x36xf32, #tpu.memory_space<vmem>>, vector<4x36xf32>
    %cst_124 = arith.constant dense<0.000000e+00> : vector<4x512xf32>
    %195 = tpu.matmul %194, %193, %cst_124 {dimension_numbers = #tpu.dot_dimension_numbers<[1], [0], [0], [1], [0, 0, 1, 1], [], []>} : vector<4x36xf32>, vector<36x512xf32>, vector<4x512xf32> -> vector<4x512xf32>
    %cst_125 = arith.constant dense<0.000000e+00> : vector<4xf32>
    %196 = vector.multi_reduction <add>, %195, %cst_125 [1] : vector<4x512xf32> to vector<4xf32>
    %197 = vector.shape_cast %196 : vector<4xf32> to vector<4x1xf32>
    %cst_126 = arith.constant 5.120000e+02 : f32
    %198 = vector.broadcast %cst_126 : f32 to vector<4x1xf32>
    %199 = arith.divf %197, %198 : vector<4x1xf32>
    %200 = vector.broadcast %199 : vector<4x1xf32> to vector<4x512xf32>
    %201 = arith.subf %195, %200 : vector<4x512xf32>
    %202 = arith.mulf %201, %201 : vector<4x512xf32>
    %cst_127 = arith.constant dense<0.000000e+00> : vector<4xf32>
    %203 = vector.multi_reduction <add>, %202, %cst_127 [1] : vector<4x512xf32> to vector<4xf32>
    %204 = vector.shape_cast %203 : vector<4xf32> to vector<4x1xf32>
    %cst_128 = arith.constant 5.120000e+02 : f32
    %205 = vector.broadcast %cst_128 : f32 to vector<4x1xf32>
    %206 = arith.divf %204, %205 : vector<4x1xf32>
    %c0_129 = arith.constant 0 : index
    %c0_130 = arith.constant 0 : index
    %207 = vector.load %arg6[%c0_129, %c0_130] : memref<4x1xf32, #tpu.memory_space<vmem>>, vector<4x1xf32>
    %cst_131 = arith.constant 9.99999974E-6 : f32
    %208 = vector.broadcast %cst_131 : f32 to vector<4x1xf32>
    %209 = arith.addf %206, %208 : vector<4x1xf32>
    %210 = math.rsqrt %209 : vector<4x1xf32>
    %211 = arith.mulf %207, %210 : vector<4x1xf32>
    %c0_132 = arith.constant 0 : index
    %c0_133 = arith.constant 0 : index
    %212 = vector.load %arg7[%c0_132, %c0_133] : memref<4x1xf32, #tpu.memory_space<vmem>>, vector<4x1xf32>
    %213 = arith.mulf %199, %211 : vector<4x1xf32>
    %214 = arith.subf %212, %213 : vector<4x1xf32>
    %215 = vector.broadcast %211 : vector<4x1xf32> to vector<4x512xf32>
    %216 = arith.mulf %195, %215 : vector<4x512xf32>
    %217 = vector.broadcast %214 : vector<4x1xf32> to vector<4x512xf32>
    %218 = arith.addf %216, %217 : vector<4x512xf32>
    %219 = arith.addf %218, %6 : vector<4x512xf32>
    %cst_134 = arith.constant 0.000000e+00 : f32
    %220 = vector.broadcast %cst_134 : f32 to vector<4x512xf32>
    %221 = arith.maximumf %219, %220 : vector<4x512xf32>
    %c0_135 = arith.constant 0 : index
    %c0_136 = arith.constant 0 : index
    %222 = vector.load %arg8[%c0_135, %c0_136] : memref<4x512xf32, #tpu.memory_space<vmem>>, vector<4x512xf32>
    tpu.vector_store %arg8[%c0_135, %c0_136], %221 {strides = array<i32>} : memref<4x512xf32, #tpu.memory_space<vmem>>, vector<4x512xf32>,
    return
  }
}

</mosaic_0001>

<bundles_post_ra>
// kernel: tpu_custom_call.1
= control target key start
LH: loop header
LB: loop body
LE: loop exit
PB: predicated region body
PF: predicated region fallthrough
CT: control target
= control target key end

     0   :  { %13 = vsyncpa [#allocation5], 0  ;;  %s2160_s0 = inlined_call_operand.vmem [shape: f32[4,512], index: 0, kind: input, shape index: {}]   ;;  %s2161_s1 = inlined_call_operand.hbm [shape: s32[2,512], index: 1, kind: input, shape index: {}]   ;;  %s2162_s2 = inlined_call_operand.vmem [shape: f32[4,36], index: 2, kind: input, shape index: {}]   ;;  %s2163_s3 = inlined_call_operand.vmem [shape: f32[4,1], index: 3, kind: input, shape index: {}]   ;;  %s2164_s4 = inlined_call_operand.vmem [shape: f32[4,1], index: 4, kind: input, shape index: {}]   ;;  %s2165_s5 = inlined_call_operand.vmem [shape: f32[4,36], index: 5, kind: input, shape index: {}]   ;;  %s2166_s6 = inlined_call_operand.vmem [shape: f32[4,1], index: 6, kind: input, shape index: {}]   ;;  %s2167_s7 = inlined_call_operand.vmem [shape: f32[4,1], index: 7, kind: input, shape index: {}]   ;;  %s2168_s8 = inlined_call_operand.hbm [shape: f32[4,512], index: 8, kind: output, shape index: {}]  }
   0x1   :  { %14 = vsyncpa [#allocation6], 0  ;;  %s22_s29 = sshll.u32 %s2161_s1, 4  ;;  %s1466_s30 = smov [#allocation4]   ;;  %s23_s29 = int_to_ptr.hbm [resolvable:$true] %s22_s29 }
   0x2   :  { %s24_s9 = sshll.u32 %s1466_s30, 4  ;;  %s25_s9 = int_to_ptr.vmem [resolvable:$true] %s24_s9 }
   0x3   :  { %27 = dma.hbm_to_vmem [thread:$0]  %s23_s29, 128, %s25_s9, [#allocation5]  }
   0x4   :  { %1462 = dma.done.wait [#allocation5], 128  }
   0x5   :  { %1463 = vsyncadd [#allocation5], 4294967168  ;;  %v1467_v0 = vmov 0.0   ;;  %v1530_v1 = vld [vmem:[%s2160_s0] sm:$0xff]  ;;  %v1535_v2 = vld [vmem:[%s2160_s0 + $0x8] sm:$0xff]  ;;  %s1468_s1 = smov 17  }
   0x6   :  { %48 = vst [vmem:[#allocation2 + $0x14] sm:$0xf] %v1467_v0  ;;  %s1469_s0 = smov 16   ;;  %s1470_s14 = smov 15   ;;  %v1476_v54 = vmov 0   ;;  %vm2170_vm3 = vcmask 138240  }
   0x7   :  { %47 = vst [vmem:[#allocation2] sm:$0xf] %v1467_v0  ;;  %s1471_s15 = smov 1   ;;  %s1472_s16 = smov 127   ;;  %1407 = vset.pattern.permute.xlu0 %v1476_v54  ;;  %vm2172_vm7 = vcmask 130048   ;;  %vm2169_vm10 = vcmask 121856  }
   0x8   :  { %51 = vst [vmem:[#allocation2 + $0x4] sm:$0xff] %v1530_v1  ;;  %s1473_s17 = smov 113   ;;  %s1474_s18 = smov 112   ;;  %v1603_v58 = vld [vmem:[#allocation4] ss:$2 sm:$0xf] }
   0x9   :  { %52 = vst [vmem:[#allocation2 + $0xc] sm:$0xff] %v1535_v2  ;;  %s1475_s19 = smov 111   ;;  %v1605_v59 = vld [vmem:[#allocation4 + $0x1] ss:$2 sm:$0xf]  ;;  %vm56_vm0 = vcmp.ge.s32.totalorder %v1603_v58, 1 }
   0xa   :  { %vm57_vm1 = vcmp.ge.s32.totalorder %v1605_v59, 1  ;;  %vm2171_vm5 = vcmp.lt.s32.totalorder %v1605_v59, 15  ;;  %vm2175_vm12 = vcmask 7168   ;;  %s1368_s30 = sshll.u32 %s2168_s8, 4  ;;  %s1369_s30 = int_to_ptr.hbm [resolvable:$true] %s1368_s30 }
   0xb   :  { %vm58_vm2 = vmand %vm56_vm0, %vm57_vm1 }
   0xc   :  { %v1620_v61 = vsel %vm58_vm2, 1, %v1476_v54  ;;  %vm176_vm6 = vmand %vm56_vm0, %vm2171_vm5  ;;  %vm2173_vm2 = vcmask 1039360  }
   0xd   :  { %v311_v24 = vld [vmem:[#allocation2 + $0x14] sm:$0xf]  ;;  %v62_v63 = vperm.slane %v1620_v61, 2 }
   0xe   :  { %v375_v33 = vld [vmem:[#allocation2 + $0x14] sm:$0xf] }
   0xf   :  { %v53_v5 = vld [vmem:[#allocation2] sm:$0xff]  ;;  %v429_v38 = vld [vmem:[#allocation2 + $0x14] sm:$0xf]  ;;  %vm1627_vm4 = vcmp.eq.s32.totalorder %v62_v63, 1 }
  0x10   :  { %v54_v3 = vld [vmem:[#allocation2 + $0x8] sm:$0xff]  ;;  %v55_v4 = vld [vmem:[#allocation2 + $0x10] sm:$0xf]  ;;  %71 = vst [vmem:[#allocation1] ss:$2 sm:$0xff] %v53_v5 }
  0x11   :  { %73 = vst [vmem:[#allocation1 + $0x10] ss:$2 sm:$0xff] %v54_v3  ;;  %v110_v6 = vld [vmem:[#allocation2 + $0x10] sm:$0xf]  ;;  %v493_v44 = vld [vmem:[#allocation2 + $0x14] sm:$0xf] }
  0x12   :  { %75 = vst [vmem:[#allocation1 + $0x20] ss:$2 sm:$0xff] %v55_v4  ;;  %v174_v12 = vld [vmem:[#allocation2 + $0x10] sm:$0xf] }
  0x13   :  { %v228_v18 = vld [vmem:[#allocation2 + $0x10] sm:$0xf] }
  0x17   :  { %v1543_v10 = vld.sshfl [vmem:[#allocation1] sm:$0xff pattern:$0x75316420]  ;;  %v1545_v11 = vld.sshfl [vmem:[#allocation1 + $0x8] sm:$0xff pattern:$0x75316420] }
  0x18   :  { %v79_v7 = vld.sshfl [vmem:[#allocation1 + $0x18] sm:$0xff pattern:$0x75316420]  ;;  %v78_v8 = vld.sshfl [vmem:[#allocation1 + $0x10] sm:$0xff pattern:$0x75316420] }
  0x19   :  { %87 = vrot.lane.b32.xlu1 %v79_v7, %s1468_s1  ;;  %85 = vrot.lane.b32.xlu0 %v78_v8, %s1468_s1  ;;  %v1541_v9 = vld.sshfl [vmem:[#allocation1 + $0x20] sm:$0xff pattern:$0x75316420]  ;;  %125 = vst [vmem:[#allocation1 + $0x10] ss:$2 sm:$0xff] %v54_v3 }
  0x1a   :  { %127 = vst [vmem:[#allocation1 + $0x20] ss:$2 sm:$0xff] %v110_v6 }
  0x1b   :  { %123 = vst [vmem:[#allocation1] ss:$2 sm:$0xff] %v53_v5 }
  0x20   :  { %v131_v13 = vld.sshfl [vmem:[#allocation1 + $0x18] sm:$0xff pattern:$0x75316420]  ;;  %v130_v14 = vld.sshfl [vmem:[#allocation1 + $0x10] sm:$0xff pattern:$0x75316420] }
  0x21   :  { %v132_v15 = vld.sshfl [vmem:[#allocation1 + $0x20] sm:$0xff pattern:$0x75316420]  ;;  %139 = vrot.lane.b32.xlu1 %v131_v13, %s1469_s0  ;;  %137 = vrot.lane.b32.xlu0 %v130_v14, %s1469_s0  ;;  %191 = vst [vmem:[#allocation1 + $0x10] ss:$2 sm:$0xff] %v54_v3 }
  0x22   :  { %141 = vrot.lane.b32.xlu2 %v132_v15, %s1469_s0  ;;  %193 = vst [vmem:[#allocation1 + $0x20] ss:$2 sm:$0xff] %v174_v12  ;;  %v1550_v16 = vld.sshfl [vmem:[#allocation1] sm:$0xff pattern:$0x75316420]  ;;  %v1665_v15 = vsel %vm176_vm6, 1, %v1476_v54 }
  0x23   :  { %v1552_v17 = vld.sshfl [vmem:[#allocation1 + $0x8] sm:$0xff pattern:$0x75316420] }
  0x24   :  { %189 = vst [vmem:[#allocation1] ss:$2 sm:$0xff] %v53_v5 }
  0x28   :  { %v197_v19 = vld.sshfl [vmem:[#allocation1 + $0x18] sm:$0xff pattern:$0x75316420]  ;;  %v196_v20 = vld.sshfl [vmem:[#allocation1 + $0x10] sm:$0xff pattern:$0x75316420] }
  0x29   :  { %205 = vrot.lane.b32.xlu0 %v197_v19, %s1470_s14  ;;  %v198_v21 = vld.sshfl [vmem:[#allocation1 + $0x20] sm:$0xff pattern:$0x75316420]  ;;  %243 = vst [vmem:[#allocation1 + $0x10] ss:$2 sm:$0xff] %v54_v3 }
  0x2a   :  { %203 = vrot.lane.b32.xlu2 %v196_v20, %s1470_s14  ;;  %245 = vst [vmem:[#allocation1 + $0x20] ss:$2 sm:$0xff] %v228_v18 }
  0x2b   :  { %v1556_v22 = vld.sshfl [vmem:[#allocation1] sm:$0xff pattern:$0x75316420]  ;;  %v1558_v23 = vld.sshfl [vmem:[#allocation1 + $0x8] sm:$0xff pattern:$0x75316420] }
  0x2c   :  { %241 = vst [vmem:[#allocation1] ss:$2 sm:$0xff] %v53_v5  ;;  %v1638_v5 = vsel %vm56_vm0, 1, %v1476_v54 }
  0x30   :  { %v249_v25 = vld.sshfl [vmem:[#allocation1 + $0x18] sm:$0xff pattern:$0x75316420]  ;;  %v248_v26 = vld.sshfl [vmem:[#allocation1 + $0x10] sm:$0xff pattern:$0x75316420] }
  0x31   :  { %207 = vrot.lane.b32.xlu0 %v198_v21, %s1470_s14  ;;  %255 = vrot.lane.b32.xlu1 %v248_v26, %s1471_s15  ;;  %v250_v27 = vld.sshfl [vmem:[#allocation1 + $0x20] sm:$0xff pattern:$0x75316420]  ;;  %296 = vst [vmem:[#allocation1 + $0x10] ss:$2 sm:$0xff] %v1535_v2  ;;  %v229_v26 = vsel %vm57_vm1, 1, %v1476_v54 }
  0x32   :  { %257 = vrot.lane.b32.xlu2 %v249_v25, %s1471_s15  ;;  %328 = vst [vmem:[#allocation1 + $0x20] ss:$2 sm:$0xff] %v311_v24 }
  0x33   :  { %v247_v28 = vld.sshfl [vmem:[#allocation1 + $0x8] sm:$0xff pattern:$0x75316420]  ;;  %v246_v29 = vld.sshfl [vmem:[#allocation1] sm:$0xff pattern:$0x75316420] }
  0x34   :  { %294 = vst [vmem:[#allocation1] ss:$2 sm:$0xff] %v1530_v1 }
  0x38   :  { %v299_v30 = vld.sshfl [vmem:[#allocation1 + $0x10] sm:$0xff pattern:$0x75316420]  ;;  %v300_v31 = vld.sshfl [vmem:[#allocation1 + $0x18] sm:$0xff pattern:$0x75316420] }
  0x39   :  { %259 = vrot.lane.b32.xlu1 %v250_v27, %s1471_s15  ;;  %v333_v32 = vld.sshfl [vmem:[#allocation1 + $0x20] sm:$0xff pattern:$0x75316420]  ;;  %326 = vst [vmem:[#allocation1 + $0x10] ss:$2 sm:$0xff] %v1535_v2 }
  0x3a   :  { %342 = vrot.lane.b32.xlu0 %v333_v32, %s1472_s16  ;;  %253 = vrot.lane.b32.xlu2 %v247_v28, %s1471_s15  ;;  %307 = vst [vmem:[#allocation3 + $0x28] sm:$0xf] %v299_v30  ;;  %v181_v30 = vperm.slane %v1665_v15, 3  ;;  %v232_v32 = vperm.slane %v229_v26, 2 }
  0x3b   :  { %308 = vst [vmem:[#allocation3 + $0x40] sm:$0xf] %v300_v31  ;;  %v297_v34 = vld.sshfl [vmem:[#allocation1] sm:$0xff pattern:$0x75316420]  ;;  %v231_v31 = vperm.slane %v229_v26, 1 }
  0x3c   :  { %v298_v35 = vld.sshfl [vmem:[#allocation1 + $0x8] sm:$0xff pattern:$0x75316420]  ;;  %305 = vst [vmem:[#allocation3 + $0x8] sm:$0xf] %v297_v34  ;;  %vm1694_vm13 = vcmp.eq.s32.totalorder %v181_v30, 1 }
  0x3d   :  { %324 = vst [vmem:[#allocation1] ss:$2 sm:$0xff] %v1530_v1  ;;  %vm1698_vm14 = vcmp.eq.s32.totalorder %v231_v31, 1  ;;  %vm1702_vm15 = vcmp.eq.s32.totalorder %v232_v32, 1  ;;  %v2226_v30 = vmov 0 }
  0x3e   :  { %306 = vst [vmem:[#allocation3 + $0x88] sm:$0xf] %v298_v35 }
  0x3f   :  { %394 = vst [vmem:[#allocation1 + $0x20] ss:$2 sm:$0xff] %v375_v33  ;;  %v312_v33 = vsel %vm2171_vm5, 1, %v1476_v54 }
  0x40   :  { %v331_v36 = vld.sshfl [vmem:[#allocation1 + $0x10] sm:$0xff pattern:$0x75316420]  ;;  %v332_v37 = vld.sshfl [vmem:[#allocation1 + $0x18] sm:$0xff pattern:$0x75316420] }
  0x41   :  { %251 = vrot.lane.b32.xlu1 %v246_v29, %s1471_s15  ;;  %392 = vst [vmem:[#allocation1 + $0x10] ss:$2 sm:$0xff] %v1535_v2  ;;  %v315_v34 = vperm.slane %v312_v33, 2 }
  0x42   :  { %338 = vrot.lane.b32.xlu2 %v331_v36, %s1472_s16  ;;  %v2212_v36 = vmov 0 }
  0x43   :  { %v2213_v36 = vsel %vm1698_vm14, 4294967295, %v2212_v36  ;;  %vm1706_vm0 = vcmp.eq.s32.totalorder %v315_v34, 1 }
  0x44   :  { %v330_v39 = vld.sshfl [vmem:[#allocation1 + $0x8] sm:$0xff pattern:$0x75316420]  ;;  %v329_v40 = vld.sshfl [vmem:[#allocation1] sm:$0xff pattern:$0x75316420] }
  0x45   :  { %336 = vrot.lane.b32.xlu0 %v330_v39, %s1472_s16  ;;  %390 = vst [vmem:[#allocation1] ss:$2 sm:$0xff] %v1530_v1 }
  0x46   :  { %v399_v41 = vld.sshfl [vmem:[#allocation1 + $0x20] sm:$0xff pattern:$0x75316420] }
  0x47   :  { %446 = vst [vmem:[#allocation1 + $0x20] ss:$2 sm:$0xff] %v429_v38 }
  0x48   :  { %v397_v42 = vld.sshfl [vmem:[#allocation1 + $0x10] sm:$0xff pattern:$0x75316420]  ;;  %v398_v43 = vld.sshfl [vmem:[#allocation1 + $0x18] sm:$0xff pattern:$0x75316420] }
  0x49   :  { %408 = vrot.lane.b32.xlu1 %v399_v41, %s1473_s17  ;;  %444 = vst [vmem:[#allocation1 + $0x10] ss:$2 sm:$0xff] %v1535_v2 }
  0x4a   :  { %340 = vrot.lane.b32.xlu2 %v332_v37, %s1472_s16  ;;  %v2214_v37 = vmov 0 }
  0x4b   :  { %v2215_v37 = vsel %vm1702_vm15, 4294967295, %v2214_v37 }
  0x4c   :  { %v395_v45 = vld.sshfl [vmem:[#allocation1] sm:$0xff pattern:$0x75316420]  ;;  %v396_v46 = vld.sshfl [vmem:[#allocation1 + $0x8] sm:$0xff pattern:$0x75316420] }
  0x4d   :  { %404 = vrot.lane.b32.xlu0 %v397_v42, %s1473_s17  ;;  %442 = vst [vmem:[#allocation1] ss:$2 sm:$0xff] %v1530_v1 }
  0x4e   :  { %v451_v47 = vld.sshfl [vmem:[#allocation1 + $0x20] sm:$0xff pattern:$0x75316420] }
  0x4f   :  { %511 = vst [vmem:[#allocation1 + $0x20] ss:$2 sm:$0xff] %v493_v44 }
  0x50   :  { %v449_v48 = vld.sshfl [vmem:[#allocation1 + $0x10] sm:$0xff pattern:$0x75316420]  ;;  %v450_v49 = vld.sshfl [vmem:[#allocation1 + $0x18] sm:$0xff pattern:$0x75316420] }
  0x51   :  { %406 = vrot.lane.b32.xlu1 %v398_v43, %s1473_s17  ;;  %509 = vst [vmem:[#allocation1 + $0x10] ss:$2 sm:$0xff] %v1535_v2 }
  0x52   :  { %334 = vrot.lane.b32.xlu2 %v329_v40, %s1472_s16  ;;  %v2216_v40 = vmov 0 }
  0x53   :  { %v2217_v40 = vsel %vm1706_vm0, 4294967295, %v2216_v40 }
  0x54   :  { %v448_v50 = vld.sshfl [vmem:[#allocation1 + $0x8] sm:$0xff pattern:$0x75316420]  ;;  %v447_v51 = vld.sshfl [vmem:[#allocation1] sm:$0xff pattern:$0x75316420] }
  0x55   :  { %456 = vrot.lane.b32.xlu0 %v449_v48, %s1474_s18  ;;  %507 = vst [vmem:[#allocation1] ss:$2 sm:$0xff] %v1530_v1 }
  0x56   :  { %v516_v52 = vld.sshfl [vmem:[#allocation1 + $0x20] sm:$0xff pattern:$0x75316420] }
  0x58   :  { %v514_v53 = vld.sshfl [vmem:[#allocation1 + $0x10] sm:$0xff pattern:$0x75316420]  ;;  %v515_v55 = vld.sshfl [vmem:[#allocation1 + $0x18] sm:$0xff pattern:$0x75316420] }
  0x59   :  { %400 = vrot.lane.b32.xlu1 %v395_v45, %s1473_s17 }
  0x5a   :  { %460 = vrot.lane.b32.xlu2 %v451_v47, %s1474_s18 }
  0x5c   :  { %v512_v56 = vld.sshfl [vmem:[#allocation1] sm:$0xff pattern:$0x75316420]  ;;  %v513_v57 = vld.sshfl [vmem:[#allocation1 + $0x8] sm:$0xff pattern:$0x75316420] }
  0x5d   :  { %458 = vrot.lane.b32.xlu0 %v450_v49, %s1474_s18 }
  0x61   :  { %133 = vrot.lane.b32.xlu1 %v1550_v16, %s1469_s0 }
  0x62   :  { %402 = vrot.lane.b32.xlu2 %v396_v46, %s1473_s17 }
  0x65   :  { %525 = vrot.lane.b32.xlu0 %v516_v52, %s1475_s19  ;;  %v233_v52 = vperm.slane %v229_v26, 3 }
  0x67   :  { %vm1725_vm6 = vcmp.eq.s32.totalorder %v233_v52, 1 }
  0x69   :  { %521 = vrot.lane.b32.xlu1 %v514_v53, %s1475_s19 }
  0x6a   :  { %452 = vrot.lane.b32.xlu2 %v447_v51, %s1474_s18 }
  0x6d   :  { %454 = vrot.lane.b32.xlu0 %v448_v50, %s1474_s18 }
  0x71   :  { %523 = vrot.lane.b32.xlu1 %v515_v55, %s1475_s19  ;;  %v316_v55 = vperm.slane %v312_v33, 3 }
  0x72   :  { %135 = vrot.lane.b32.xlu2 %v1552_v17, %s1469_s0 }
  0x75   :  { %89 = vrot.lane.b32.xlu0 %v1541_v9, %s1468_s1  ;;  %v115_v9 = vperm.slane %v1638_v5, 3 }
  0x77   :  { %vm1654_vm8 = vcmp.eq.s32.totalorder %v115_v9, 1 }
  0x79   :  { %517 = vrot.lane.b32.xlu1 %v512_v56, %s1475_s19  ;;  %v2218_v56 = vmov 0 }
  0x7a   :  { %519 = vrot.lane.b32.xlu2 %v513_v57, %s1475_s19  ;;  %v2219_v56 = vsel %vm1725_vm6, 4294967295, %v2218_v56 }
  0x7c   :  { %v142_v60 = vpop.permute.xlu2 %141 }
  0x7d   :  { %199 = vrot.lane.b32.xlu0 %v1556_v22, %s1470_s14 }
  0x81   :  { %201 = vrot.lane.b32.xlu1 %v1558_v23, %s1470_s14  ;;  %v180_v23 = vperm.slane %v1665_v15, 2 }
  0x82   :  { %81 = vrot.lane.b32.xlu2 %v1543_v10, %s1468_s1  ;;  %v114_v10 = vperm.slane %v1638_v5, 2 }
  0x83   :  { %vm1677_vm11 = vcmp.eq.s32.totalorder %v180_v23, 1 }
  0x84   :  { %v1622_v62 = vpop.permute.xlu2 %203  ;;  %vm1658_vm9 = vcmp.eq.s32.totalorder %v114_v10, 1 }
  0x85   :  { %83 = vrot.lane.b32.xlu0 %v1545_v11, %s1468_s1 }
  0x8b   :  { %v1631_v3 = vpop.permute.xlu1 %87  ;;  %v1633_v4 = vpop.permute.xlu0 %85 }
  0x8c   :  { %v94_v6 = vsel %vm2170_vm3, %v1633_v4, %v1631_v3  ;;  %v1643_v7 = vpop.permute.xlu2 %257  ;;  %vm2176_vm3 = vcmp.lt.s32.totalorder %v1603_v58, 15 }
  0x8d   :  { %v102_v8 = vsel %vm1627_vm4, %v94_v6, 0.0 }
  0x8e   :  { %106 = vst [vmem:[#allocation3 + $0x50] sm:$0xf] %v102_v8 }
  0x93   :  { %v140_v13 = vpop.permute.xlu1 %139  ;;  %v1662_v14 = vpop.permute.xlu0 %137 }
  0x94   :  { %v147_v16 = vsel %vm2172_vm7, %v140_v13, %v142_v60  ;;  %v146_v17 = vsel %vm2172_vm7, %v1662_v14, %v140_v13  ;;  %v1670_v18 = vpop.permute.xlu2 %253  ;;  %v2220_v60 = vmov 0  ;;  %vm377_vm7 = vmand %vm2176_vm3, %vm57_vm1 }
  0x95   :  { %v155_v19 = vsel %vm1654_vm8, %v147_v16, 0.0  ;;  %v154_v20 = vsel %vm1658_vm9, %v146_v17, 0.0  ;;  %v230_v17 = vperm.slane %v229_v26, 0 }
  0x96   :  { %v163_v21 = vrot.slane %v155_v19, 4  ;;  %v162_v22 = vrot.slane %v154_v20, 4  ;;  %v2222_v20 = vmov 0 }
  0x97   :  { %vm1741_vm5 = vcmp.eq.s32.totalorder %v230_v17, 1 }
  0x98   :  { %171 = vst [vmem:[#allocation3 + $0x18] sm:$0xf0] %v163_v21  ;;  %v2223_v20 = vsel %vm1741_vm5, 4294967295, %v2222_v20  ;;  %v314_v21 = vperm.slane %v312_v33, 1 }
  0x99   :  { %170 = vst [vmem:[#allocation3 + $0x50] sm:$0xf0] %v162_v22 }
  0x9b   :  { %v206_v25 = vpop.permute.xlu0 %205 }
  0x9c   :  { %v212_v27 = vsel %vm2169_vm10, %v1622_v62, %v206_v25  ;;  %v1686_v28 = vpop.permute.xlu2 %338 }
  0x9d   :  { %v220_v29 = vsel %vm1677_vm11, %v212_v27, 0.0 }
  0x9e   :  { %224 = vst [vmem:[#allocation3 + $0x78] sm:$0xf] %v220_v29  ;;  %v2224_v29 = vmov 0 }
  0xa3   :  { %v208_v38 = vpop.permute.xlu0 %207  ;;  %v256_v39 = vpop.permute.xlu1 %255 }
  0xa4   :  { %v213_v41 = vsel %vm2169_vm10, %v206_v25, %v208_v38  ;;  %v263_v42 = vsel %vm2175_vm12, %v1670_v18, %v256_v39  ;;  %v264_v43 = vsel %vm2175_vm12, %v256_v39, %v1643_v7  ;;  %v341_v44 = vpop.permute.xlu2 %340  ;;  %vm1729_vm10 = vcmp.eq.s32.totalorder %v316_v55, 1 }
  0xa5   :  { %v221_v45 = vsel %vm1694_vm13, %v213_v41, 0.0  ;;  %v271_v46 = vsel %vm1698_vm14, %v263_v42, 0.0  ;;  %v272_v47 = vsel %vm1702_vm15, %v264_v43, 0.0  ;;  %v347_v48 = vsel %vm2173_vm2, %v1686_v28, %v341_v44 }
  0xa6   :  { %225 = vst [vmem:[#allocation3 + $0x80] sm:$0xf] %v221_v45  ;;  %v279_v49 = vrot.slane %v271_v46, 4  ;;  %v280_v50 = vrot.slane %v272_v47, 4  ;;  %v355_v51 = vsel %vm1706_vm0, %v347_v48, 0.0  ;;  %v2221_v60 = vsel %vm1729_vm10, 4294967295, %v2220_v60 }
  0xa7   :  { %v363_v53 = vrot.slane %v355_v51, 4  ;;  %v2230_v45 = vmov 0 }
  0xa8   :  { %287 = vst [vmem:[#allocation3 + $0x68] sm:$0xf0] %v279_v49 }
  0xa9   :  { %288 = vst [vmem:[#allocation3 + $0x78] sm:$0xf0] %v280_v50  ;;  %v2232_v50 = vmov 0 }
  0xaa   :  { %371 = vst [vmem:[#allocation3 + $0x28] sm:$0xf0] %v363_v53 }
  0xab   :  { %v260_v57 = vpop.permute.xlu1 %259 }
  0xac   :  { %v265_v63 = vsel %vm2175_vm12, %v1643_v7, %v260_v57  ;;  %v343_v6 = vpop.permute.xlu0 %342  ;;  %v335_v8 = vpop.permute.xlu2 %334  ;;  %v313_v7 = vperm.slane %v312_v33, 0 }
  0xad   :  { %v273_v9 = vsel %vm1725_vm6, %v265_v63, 0.0  ;;  %v348_v10 = vsel %vm2173_vm2, %v341_v44, %v343_v6 }
  0xae   :  { %v281_v13 = vrot.slane %v273_v9, 4  ;;  %v356_v16 = vsel %vm1729_vm10, %v348_v10, 0.0  ;;  %vm1753_vm2 = vcmp.eq.s32.totalorder %v313_v7, 1  ;;  %vm1757_vm10 = vcmp.eq.s32.totalorder %v314_v21, 1 }
  0xaf   :  { %v364_v19 = vrot.slane %v356_v16, 4  ;;  %v2225_v29 = vsel %vm1753_vm2, 4294967295, %v2224_v29  ;;  %v2227_v30 = vsel %vm1757_vm10, 4294967295, %v2226_v30 }
  0xb0   :  { %289 = vst [vmem:[#allocation3 + $0x80] sm:$0xf0] %v281_v13  ;;  %v113_v13 = vperm.slane %v1638_v5, 1 }
  0xb1   :  { %372 = vst [vmem:[#allocation3 + $0x40] sm:$0xf0] %v364_v19  ;;  %v2237_v19 = vmov 0 }
  0xb3   :  { %v252_v22 = vpop.permute.xlu1 %251 }
  0xb4   :  { %v262_v23 = vsel %vm2175_vm12, %v252_v22, %v1670_v18  ;;  %v461_v25 = vpop.permute.xlu2 %460  ;;  %v378_v18 = vsel %vm377_vm7, 1, %v1476_v54  ;;  %vm2228_vm12 = vcmask 1039360   ;;  %vm2178_vm7 = vcmask 924672  }
  0xb5   :  { %v270_v26 = vsel %vm1741_vm5, %v262_v23, 0.0  ;;  %vm2229_vm1 = vmmov %vm2228_vm12  ;;  %v380_v42 = vperm.slane %v378_v18, 1  ;;  %v381_v46 = vperm.slane %v378_v18, 2 }
  0xb6   :  { %v278_v27 = vrot.slane %v270_v26, 4 }
  0xb7   :  { %v337_v31 = vpop.permute.xlu0 %336  ;;  %vm1769_vm3 = vcmp.eq.s32.totalorder %v380_v42, 1 }
  0xb8   :  { %286 = vst [vmem:[#allocation3 + $0x30] sm:$0xf0] %v278_v27  ;;  %v345_v32 = vsel %vm2228_vm12, %v335_v8, %v337_v31  ;;  %v346_v33 = vsel %vm2229_vm1, %v337_v31, %v1686_v28  ;;  %v2231_v45 = vsel %vm1769_vm3, 4294967295, %v2230_v45  ;;  %v382_v28 = vperm.slane %v378_v18, 3 }
  0xb9   :  { %v353_v34 = vsel %vm1753_vm2, %v345_v32, 0.0  ;;  %v354_v38 = vsel %vm1757_vm10, %v346_v33, 0.0  ;;  %vm1776_vm12 = vcmp.eq.s32.totalorder %v381_v46, 1  ;;  %v379_v8 = vperm.slane %v378_v18, 0 }
  0xba   :  { %v361_v39 = vrot.slane %v353_v34, 4  ;;  %v362_v41 = vrot.slane %v354_v38, 4  ;;  %v2233_v50 = vsel %vm1776_vm12, 4294967295, %v2232_v50  ;;  %vm1780_vm1 = vcmp.eq.s32.totalorder %v382_v28, 1 }
  0xbb   :  { %v409_v43 = vpop.permute.xlu1 %408  ;;  %vm2241_vm10 = vcmask 924672   ;;  %vm2186_vm2 = vcmask 916480   ;;  %v2243_v31 = vmov 0  ;;  %v2245_v18 = vmov 0 }
  0xbc   :  { %369 = vst [vmem:[#allocation3 + $0x8] sm:$0xf0] %v361_v39  ;;  %v403_v44 = vpop.permute.xlu2 %402  ;;  %v112_v33 = vperm.slane %v1638_v5, 0 }
  0xbd   :  { %370 = vst [vmem:[#allocation3 + $0x88] sm:$0xf0] %v362_v41 }
  0xbe   :  { %vm1828_vm5 = vcmp.eq.s32.totalorder %v112_v33, 1 }
  0xbf   :  { %v405_v47 = vpop.permute.xlu0 %404 }
  0xc0   :  { %v412_v48 = vsel %vm2178_vm7, %v403_v44, %v405_v47 }
  0xc1   :  { %v420_v49 = vsel %vm1769_vm3, %v412_v48, 0.0  ;;  %vm2236_vm3 = vcmp.lt.s32.totalorder %v1603_v58, 15 }
  0xc2   :  { %424 = vst [vmem:[#allocation3 + $0x10] sm:$0xf] %v420_v49  ;;  %v430_v10 = vsel %vm2236_vm3, 1, %v1476_v54  ;;  %vm2242_vm3 = vcmask 130048  }
  0xc3   :  { %v407_v52 = vpop.permute.xlu1 %406  ;;  %v433_v16 = vperm.slane %v430_v10, 2  ;;  %v434_v17 = vperm.slane %v430_v10, 3 }
  0xc4   :  { %v413_v53 = vsel %vm2178_vm7, %v405_v47, %v407_v52  ;;  %v414_v55 = vsel %vm2178_vm7, %v407_v52, %v409_v43  ;;  %v453_v57 = vpop.permute.xlu2 %452  ;;  %vm1794_vm7 = vcmp.eq.s32.totalorder %v379_v8, 1  ;;  %v431_v52 = vperm.slane %v430_v10, 0 }
  0xc5   :  { %v421_v63 = vsel %vm1776_vm12, %v413_v53, 0.0  ;;  %v422_v6 = vsel %vm1780_vm1, %v414_v55, 0.0  ;;  %v2238_v19 = vsel %vm1794_vm7, 4294967295, %v2237_v19  ;;  %vm1798_vm12 = vcmp.eq.s32.totalorder %v113_v13, 1 }
  0xc6   :  { %425 = vst [vmem:[#allocation3 + $0x98] sm:$0xf] %v421_v63  ;;  %vm1807_vm0 = vcmp.eq.s32.totalorder %v433_v16, 1  ;;  %vm1811_vm14 = vcmp.eq.s32.totalorder %v434_v17, 1  ;;  %v432_v53 = vperm.slane %v430_v10, 1  ;;  %v2252_v55 = vmov 0 }
  0xc7   :  { %426 = vst [vmem:[#allocation3 + $0x60] sm:$0xf] %v422_v6  ;;  %v457_v9 = vpop.permute.xlu0 %456  ;;  %v2244_v31 = vsel %vm1807_vm0, 4294967295, %v2243_v31  ;;  %v2246_v18 = vsel %vm1811_vm14, 4294967295, %v2245_v18  ;;  %v2254_v13 = vmov 0  ;;  %v2256_v16 = vmov 0 }
  0xcb   :  { %v401_v7 = vpop.permute.xlu1 %400 }
  0xcc   :  { %v411_v22 = vsel %vm2241_vm10, %v401_v7, %v403_v44  ;;  %v136_v23 = vpop.permute.xlu2 %135  ;;  %vm2247_vm10 = vcmp.lt.s32.totalorder %v1605_v59, 15 }
  0xcd   :  { %v419_v26 = vsel %vm1794_vm7, %v411_v22, 0.0  ;;  %v145_v27 = vsel %vm2242_vm3, %v136_v23, %v1662_v14  ;;  %vm2248_vm3 = vcmp.lt.s32.totalorder %v1603_v58, 15 }
  0xce   :  { %423 = vst [vmem:[#allocation3 + $0x58] sm:$0xf] %v419_v26  ;;  %v153_v32 = vsel %vm1798_vm12, %v145_v27, 0.0  ;;  %vm494_vm7 = vmand %vm2248_vm3, %vm2247_vm10  ;;  %vm2189_vm10 = vcmask 908288   ;;  %v2260_v27 = vmov 0 }
  0xcf   :  { %v459_v34 = vpop.permute.xlu0 %458  ;;  %v161_v38 = vrot.slane %v153_v32, 4 }
  0xd0   :  { %v465_v39 = vsel %vm2186_vm2, %v457_v9, %v459_v34  ;;  %v466_v14 = vsel %vm2186_vm2, %v459_v34, %v461_v25  ;;  %v495_v25 = vsel %vm494_vm7, 1, %v1476_v54  ;;  %vm2251_vm2 = vcmask 130048  }
  0xd1   :  { %v473_v41 = vsel %vm1807_vm0, %v465_v39, 0.0  ;;  %v474_v42 = vsel %vm1811_vm14, %v466_v14, 0.0  ;;  %169 = vst [vmem:[#allocation3 + $0x38] sm:$0xf0] %v161_v38  ;;  %v497_v47 = vperm.slane %v495_v25, 1  ;;  %v498_v8 = vperm.slane %v495_v25, 2 }
  0xd2   :  { %v481_v43 = vrot.slane %v473_v41, 4  ;;  %v482_v5 = vrot.slane %v474_v42, 4  ;;  %vm1847_vm7 = vcmp.eq.s32.totalorder %v432_v53, 1  ;;  %v499_v10 = vperm.slane %v495_v25, 3  ;;  %v553_v53 = vld [vmem:[#allocation3 + $0x88] sm:$0xff] }
  0xd3   :  { %v134_v46 = vpop.permute.xlu1 %133  ;;  %vm1836_vm3 = vcmp.eq.s32.totalorder %v497_v47, 1  ;;  %v2257_v16 = vsel %vm1847_vm7, 4294967295, %v2256_v16  ;;  %vm2258_vm14 = vcmask 916480   ;;  %v2262_v34 = vmov 0 }
  0xd4   :  { %489 = vst [vmem:[#allocation3 + $0x98] sm:$0xf0] %v481_v43  ;;  %v144_v58 = vsel %vm2251_vm2, %v134_v46, %v136_v23  ;;  %v520_v49 = vpop.permute.xlu2 %519  ;;  %v2253_v55 = vsel %vm1836_vm3, 4294967295, %v2252_v55  ;;  %vm1843_vm2 = vcmp.eq.s32.totalorder %v431_v52, 1  ;;  %vm2259_vm0 = vmmov %vm2258_vm14 }
  0xd5   :  { %490 = vst [vmem:[#allocation3 + $0x60] sm:$0xf0] %v482_v5  ;;  %v152_v59 = vsel %vm1828_vm5, %v144_v58, 0.0  ;;  %v2255_v13 = vsel %vm1843_vm2, 4294967295, %v2254_v13  ;;  %v496_v5 = vperm.slane %v495_v25, 0 }
  0xd6   :  { %v160_v28 = vrot.slane %v152_v59, 4 }
  0xd7   :  { %v526_v48 = vpop.permute.xlu0 %525 }
  0xd8   :  { %168 = vst [vmem:[#allocation3] sm:$0xf0] %v160_v28  ;;  %v2269_v28 = vmov 0 }
  0xdb   :  { %v522_v54 = vpop.permute.xlu1 %521 }
  0xdc   :  { %v529_v63 = vsel %vm2189_vm10, %v520_v49, %v522_v54  ;;  %vm1857_vm10 = vcmp.eq.s32.totalorder %v498_v8, 1 }
  0xdd   :  { %v537_v6 = vsel %vm1836_vm3, %v529_v63, 0.0  ;;  %v2261_v27 = vsel %vm1857_vm10, 4294967295, %v2260_v27  ;;  %vm1861_vm3 = vcmp.eq.s32.totalorder %v499_v10, 1  ;;  %v178_v63 = vperm.slane %v1665_v15, 0  ;;  %v558_v10 = vld [vmem:[#allocation3 + $0x98] sm:$0xff] }
  0xde   :  { %541 = vst [vmem:[#allocation3 + $0x48] sm:$0xf] %v537_v6  ;;  %v2263_v34 = vsel %vm1861_vm3, 4294967295, %v2262_v34  ;;  %v179_v6 = vperm.slane %v1665_v15, 1  ;;  %v2274_v15 = vmov 0 }
  0xdf   :  { %v455_v17 = vpop.permute.xlu0 %454 }
  0xe0   :  { %v463_v7 = vsel %vm2258_vm14, %v453_v57, %v455_v17  ;;  %v464_v22 = vsel %vm2259_vm0, %v455_v17, %v457_v9  ;;  %v63_v57 = vperm.slane %v1620_v61, 3  ;;  %vm2194_vm14 = vcmask 1043456   ;;  %v554_v17 = vld [vmem:[#allocation3 + $0x28] sm:$0xff] }
  0xe1   :  { %v471_v23 = vsel %vm1843_vm2, %v463_v7, 0.0  ;;  %v472_v26 = vsel %vm1847_vm7, %v464_v22, 0.0  ;;  %vm2264_vm0 = vcmask 908288   ;;  %v555_v7 = vld [vmem:[#allocation3 + $0x40] sm:$0xff]  ;;  %v61_v22 = vperm.slane %v1620_v61, 1 }
  0xe2   :  { %v479_v32 = vrot.slane %v471_v23, 4  ;;  %v480_v33 = vrot.slane %v472_v26, 4  ;;  %vm2265_vm2 = vmmov %vm2264_vm0  ;;  %vm1872_vm7 = vcmp.eq.s32.totalorder %v63_v57, 1  ;;  %v60_v23 = vperm.slane %v1620_v61, 0  ;;  %v564_v61 = vld [vmem:[%s2162_s2] sm:$0xf] }
  0xe3   :  { %v524_v38 = vpop.permute.xlu1 %523  ;;  %v2272_v26 = vmov 0 }
  0xe4   :  { %487 = vst [vmem:[#allocation3 + $0x58] sm:$0xf0] %v479_v32  ;;  %v530_v9 = vsel %vm2264_vm0, %v522_v54, %v524_v38  ;;  %v531_v39 = vsel %vm2265_vm2, %v524_v38, %v526_v48  ;;  %vm2268_vm2 = vcmask 138240   ;;  %vm1881_vm0 = vcmp.eq.s32.totalorder %v496_v5, 1  ;;  %v546_v5 = vld [vmem:[#allocation3 + $0x50] sm:$0xff] }
  0xe5   :  { %488 = vst [vmem:[#allocation3 + $0x10] sm:$0xf0] %v480_v33  ;;  %v538_v14 = vsel %vm1857_vm10, %v530_v9, 0.0  ;;  %v539_v41 = vsel %vm1861_vm3, %v531_v39, 0.0  ;;  %v561_v42 = vld [vmem:[#allocation3 + $0x48] sm:$0xf]  ;;  %v82_v39 = vpop.permute.xlu2 %81 }
  0xe6   :  { %542 = vst [vmem:[#allocation3 + $0x70] sm:$0xf] %v538_v14  ;;  %1380 = vmatpush.msk.msra.mxu1 %vm2194_vm14, %v561_v42  ;;  %v2270_v28 = vsel %vm1881_vm0, 4294967295, %v2269_v28  ;;  %vm2271_vm3 = vcmask 908288   ;;  %v550_v33 = vld [vmem:[#allocation3 + $0x78] sm:$0xff]  ;;  %v551_v9 = vld [vmem:[#allocation3 + $0x80] sm:$0xff] }
  0xe7   :  { %543 = vst [vmem:[#allocation3 + $0x90] sm:$0xf] %v539_v41  ;;  %v90_v46 = vpop.permute.xlu0 %89  ;;  %vm2282_vm10 = vcmask 1043456  }
  0xe8   :  { %v95_v58 = vsel %vm2268_vm2, %v1631_v3, %v90_v46  ;;  %vm1898_vm2 = vcmp.eq.s32.totalorder %v179_v6, 1  ;;  %v2278_v46 = vmov 0 }
  0xe9   :  { %v103_v59 = vsel %vm1872_vm7, %v95_v58, 0.0  ;;  %v2275_v15 = vsel %vm1898_vm2, 4294967295, %v2274_v15 }
  0xea   :  { %107 = vst [vmem:[#allocation3 + $0x18] sm:$0xf] %v103_v59 }
  0xeb   :  { %v518_v47 = vpop.permute.xlu1 %517 }
  0xec   :  { %v557_v48 = vld [vmem:[#allocation3 + $0x10] sm:$0xff]  ;;  %v528_v52 = vsel %vm2271_vm3, %v518_v47, %v520_v49  ;;  %v559_v49 = vld [vmem:[#allocation3 + $0x60] sm:$0xff]  ;;  %vm1894_vm3 = vcmp.eq.s32.totalorder %v178_v63, 1  ;;  %v556_v47 = vld [vmem:[#allocation3 + $0x58] sm:$0xff] }
  0xed   :  { %614 = vmatpush.msra.mxu1 %v557_v48  ;;  %v536_v25 = vsel %vm1881_vm0, %v528_v52, 0.0  ;;  %v562_v54 = vld [vmem:[#allocation3 + $0x70] sm:$0xf]  ;;  %v2273_v26 = vsel %vm1894_vm3, 4294967295, %v2272_v26 }
  0xee   :  { %540 = vst [vmem:[#allocation3 + $0x20] sm:$0xf] %v536_v25  ;;  %1382 = vmatpush.msk.msra.mxu2 %vm2194_vm14, %v562_v54  ;;  %v563_v3 = vld [vmem:[#allocation3 + $0x90] sm:$0xf]  ;;  %v552_v54 = vld [vmem:[#allocation3 + $0x8] sm:$0xff] }
  0xef   :  { %615 = vmatpush.msra.mxu1 %v553_v53  ;;  %v200_v8 = vpop.permute.xlu0 %199  ;;  %1384 = vmatpush.msk.msra.mxu3 %vm2194_vm14, %v563_v3  ;;  %vm2276_vm14 = vcmask 121856  }
  0xf0   :  { %634 = vmatpush.msra.mxu2 %v558_v10  ;;  %vm2277_vm0 = vmmov %vm2276_vm14 }
  0xf1   :  { %654 = vmatpush.msra.mxu3 %v559_v49  ;;  %v547_v58 = vld [vmem:[#allocation3 + $0x18] sm:$0xff] }
  0xf2   :  { %635 = vmatpush.msra.mxu2 %v554_v17 }
  0xf3   :  { %655 = vmatpush.msra.mxu3 %v555_v7  ;;  %v202_v32 = vpop.permute.xlu1 %201 }
  0xf4   :  { %v210_v57 = vsel %vm2276_vm14, %v200_v8, %v202_v32  ;;  %v211_v38 = vsel %vm2277_vm0, %v202_v32, %v1622_v62  ;;  %636 = vmatpush.msra.mxu2 %v550_v33  ;;  %vm1912_vm14 = vcmp.eq.s32.totalorder %v61_v22, 1  ;;  %vm1916_vm0 = vcmp.eq.s32.totalorder %v60_v23, 1 }
  0xf5   :  { %v218_v14 = vsel %vm1894_vm3, %v210_v57, 0.0  ;;  %v219_v41 = vsel %vm1898_vm2, %v211_v38, 0.0  ;;  %656 = vmatpush.msra.mxu3 %v551_v9  ;;  %v560_v42 = vld [vmem:[#allocation3 + $0x20] sm:$0xf]  ;;  %v2279_v46 = vsel %vm1912_vm14, 4294967295, %v2278_v46  ;;  %vm2283_vm2 = vcmask 293888  }
  0xf6   :  { %222 = vst [vmem:[#allocation3 + $0x30] sm:$0xf] %v218_v14  ;;  %1378 = vmatpush.msk.msra.mxu0 %vm2282_vm10, %v560_v42  ;;  %637 = vmatpush.msra.mxu2 %v546_v5  ;;  %vm2284_vm3 = vcmask 138240   ;;  %vm2286_vm15 = vmmov %vm2283_vm2  ;;  %v1477_v9 = vmov 512.0  }
  0xf7   :  { %v84_v59 = vpop.permute.xlu0 %83  ;;  %223 = vst [vmem:[#allocation3 + $0x68] sm:$0xf] %v219_v41  ;;  %657 = vmatpush.msra.mxu3 %v547_v58  ;;  %1383 = vmatmul.msk.f32.vlgmr.msra.gmra.mxu2 %vm2283_vm2, %v564_v61  ;;  %vm2285_vm6 = vmmov %vm2284_vm3  ;;  %1408 = vrcp.f32 %v1477_v9 }
  0xf8   :  { %v93_v48 = vsel %vm2284_vm3, %v84_v59, %v1633_v4  ;;  %v92_v52 = vsel %vm2285_vm6, %v82_v39, %v84_v59  ;;  %594 = vmatpush.msra.mxu0 %v556_v47  ;;  %1385 = vmatmul.msk.f32.vlgmr.msra.gmra.mxu3 %vm2286_vm15, %v564_v61  ;;  %vm2287_vm6 = vmmov %vm2283_vm2 }
  0xf9   :  { %v101_v53 = vsel %vm1912_vm14, %v93_v48, 0.0  ;;  %v100_v25 = vsel %vm1916_vm0, %v92_v52, 0.0  ;;  %vm2288_vm15 = vmmov %vm2283_vm2 }
  0xfa   :  { %105 = vst [vmem:[#allocation3 + $0x38] sm:$0xf] %v101_v53  ;;  %595 = vmatpush.msra.mxu0 %v552_v54  ;;  %vm2289_vm3 = vmmov %vm2282_vm10 }
  0xfb   :  { %104 = vst [vmem:[#allocation3] sm:$0xf] %v100_v25  ;;  %vm2290_vm2 = vmmov %vm2289_vm3 }
  0xfc   :  { %vm2291_vm14 = vmmov %vm2290_vm2 }
  0xfd   :  { %v548_v3 = vld [vmem:[#allocation3 + $0x30] sm:$0xff] }
  0xfe   :  { %596 = vmatpush.msra.mxu0 %v548_v3  ;;  %v549_v63 = vld [vmem:[#allocation3 + $0x68] sm:$0xff] }
  0xff   :  { %616 = vmatpush.msra.mxu1 %v549_v63 }
 0x101   :  { %v545_v4 = vld [vmem:[#allocation3 + $0x38] sm:$0xff] }
 0x102   :  { %v544_v6 = vld [vmem:[#allocation3] sm:$0xff]  ;;  %617 = vmatpush.msra.mxu1 %v545_v4 }
 0x103   :  { %597 = vmatpush.msra.mxu0 %v544_v6  ;;  %1381 = vmatmul.msk.f32.vlgmr.msra.gmra.mxu1 %vm2287_vm6, %v564_v61 }
 0x104   :  { %1379 = vmatmul.msk.f32.vlgmr.msra.gmra.mxu0 %vm2288_vm15, %v564_v61  ;;  %v1409_v61 = vpop.eup %1408  ;;  %vm2293_vm15 = vmmov %vm2290_vm2 }
 0x105   :  { %v672_v39 = vmul.f32 512.0, %v1409_v61  ;;  %vm676_vm6 = vweird.f32 %v1409_v61 }
 0x107   :  { %v673_v14 = vsub.f32 1.0, %v672_v39 }
 0x109   :  { %v674_v41 = vmul.f32 %v1409_v61, %v673_v14 }
 0x10b   :  { %v675_v42 = vadd.f32 %v1409_v61, %v674_v41 }
 0x10d   :  { %v1939_v5 = vsel %vm676_vm6, %v1409_v61, %v675_v42 }
 0x17a   :  { %v1932_v8 = vpop.f32.mrf.mxu2 }
 0x17b   :  { %v659_v7 = vpop.f32.mrf.mxu3  ;;  %v665_v23 = vsel %vm2290_vm2, %v1932_v8, 0.0 }
 0x17c   :  { %v667_v33 = vsel %vm2291_vm14, %v659_v7, 0.0  ;;  %vm2292_vm14 = vmmov %vm2290_vm2 }
 0x180   :  { %v619_v10 = vpop.f32.mrf.mxu1 }
 0x181   :  { %v599_v49 = vpop.f32.mrf.mxu0  ;;  %v663_v17 = vsel %vm2282_vm10, %v619_v10, 0.0  ;;  %vm2294_vm10 = vmmov %vm2290_vm2 }
 0x182   :  { %v662_v22 = vsel %vm2289_vm3, %v599_v49, 0.0  ;;  %vm2295_vm3 = vmmov %vm2290_vm2 }
 0x183   :  { %v664_v32 = vadd.f32 %v663_v17, %v662_v22 }
 0x185   :  { %v666_v57 = vadd.f32 %v665_v23, %v664_v32 }
 0x187   :  { %v668_v38 = vadd.f32 %v667_v33, %v666_v57 }
 0x189   :  { %669 = vadd.xlane.f32.xlu1 %v668_v38 }
 0x1fc   :  { %v670_v58 = vpop.xlane.xlu1 %669 }
 0x1fd   :  { %v678_v59 = vmul.f32 %v1939_v5, %v670_v58  ;;  %v697_v58 = vld [vmem:[%s2163_s3] sm:$0xf] }
 0x1ff   :  { %v679_v47 = vsub.f32 %v599_v49, %v678_v59  ;;  %v680_v48 = vsub.f32 %v619_v10, %v678_v59  ;;  %v681_v52 = vsub.f32 %v1932_v8, %v678_v59  ;;  %v682_v53 = vsub.f32 %v659_v7, %v678_v59 }
 0x201   :  { %v683_v25 = vmul.f32 %v679_v47, %v679_v47  ;;  %v684_v54 = vmul.f32 %v680_v48, %v680_v48  ;;  %v685_v3 = vmul.f32 %v681_v52, %v681_v52  ;;  %v686_v63 = vmul.f32 %v682_v53, %v682_v53 }
 0x203   :  { %v687_v4 = vsel %vm2292_vm14, %v683_v25, 0.0  ;;  %v688_v6 = vsel %vm2293_vm15, %v684_v54, 0.0  ;;  %v690_v22 = vsel %vm2294_vm10, %v685_v3, 0.0  ;;  %v692_v32 = vsel %vm2295_vm3, %v686_v63, 0.0  ;;  %v710_v25 = vld [vmem:[%s2164_s4] sm:$0xf]  ;;  %vm2296_vm15 = vmmov %vm2295_vm3 }
 0x204   :  { %v689_v17 = vadd.f32 %v688_v6, %v687_v4  ;;  %vm2297_vm10 = vmmov %vm2295_vm3  ;;  %vm2298_vm3 = vcmask 138240  }
 0x206   :  { %v691_v23 = vadd.f32 %v690_v22, %v689_v17 }
 0x208   :  { %v693_v33 = vadd.f32 %v692_v32, %v691_v23 }
 0x20a   :  { %694 = vadd.xlane.f32.xlu2 %v693_v33 }
 0x27d   :  { %v695_v57 = vpop.xlane.xlu2 %694 }
 0x27e   :  { %v696_v38 = vmul.f32 %v695_v57, %v1939_v5 }
 0x280   :  { %v698_v9 = vadd.f32 1e-05, %v696_v38 }
 0x282   :  { %1410 = vrsqrt.f32 %v698_v9  ;;  %vm705_vm6 = vweird.f32 %v698_v9 }
 0x288   :  { %v1411_v61 = vpop.eup %1410 }
 0x289   :  { %v700_v39 = vmul.f32 %v1411_v61, %v698_v9  ;;  %vm706_vm2 = vweird.f32 %v1411_v61 }
 0x28a   :  { %vm707_vm14 = vmor %vm705_vm6, %vm706_vm2  ;;  %vm2300_vm6 = vcmask 130048  }
 0x28b   :  { %v701_v14 = vmul.f32 %v1411_v61, %v700_v39  ;;  %vm2299_vm2 = vmmov %vm2298_vm3 }
 0x28d   :  { %v702_v41 = vmul.f32 0.5, %v701_v14 }
 0x28f   :  { %v703_v42 = vsub.f32 1.5, %v702_v41 }
 0x291   :  { %v704_v47 = vmul.f32 %v1411_v61, %v703_v42 }
 0x293   :  { %v708_v48 = vsel %vm707_vm14, %v1411_v61, %v704_v47 }
 0x294   :  { %v709_v52 = vmul.f32 %v708_v48, %v697_v58 }
 0x296   :  { %715 = vperm.xlu0 %1407, %v709_v52   ;;  %v711_v53 = vmul.f32 %v709_v52, %v678_v59 }
 0x298   :  { %v712_v54 = vsub.f32 %v710_v25, %v711_v53 }
 0x29e   :  { %724 = vperm.xlu0 %1407, %v712_v54  }
 0x308   :  { %v716_v3 = vpop.permute.xlu0 %715 }
 0x309   :  { %v718_v63 = vmul.f32 %v716_v3, %v599_v49  ;;  %v719_v4 = vmul.f32 %v716_v3, %v619_v10  ;;  %v720_v6 = vmul.f32 %v716_v3, %v1932_v8  ;;  %v721_v17 = vmul.f32 %v716_v3, %v659_v7 }
 0x310   :  { %v725_v22 = vpop.permute.xlu0 %724 }
 0x311   :  { %v727_v23 = vadd.f32 %v725_v22, %v718_v63  ;;  %v728_v32 = vadd.f32 %v725_v22, %v719_v4  ;;  %v729_v33 = vadd.f32 %v725_v22, %v720_v6  ;;  %v730_v57 = vadd.f32 %v725_v22, %v721_v17 }
 0x313   :  { %v732_v38 = vmax.f32 %v728_v32, 0.0  ;;  %v734_v9 = vmax.f32 %v730_v57, 0.0  ;;  %v731_v59 = vmax.f32 %v727_v23, 0.0  ;;  %v733_v61 = vmax.f32 %v729_v33, 0.0 }
 0x315   :  { %v739_v39 = vrot.slane %v732_v38, 4  ;;  %v740_v14 = vrot.slane %v734_v9, 4 }
 0x317   :  { %v1956_v41 = vsel %vm2296_vm15, %v731_v59, %v739_v39  ;;  %v1959_v49 = vsel %vm2297_vm10, %v733_v61, %v740_v14  ;;  %v960_v59 = vld [vmem:[#allocation2 + $0x14] sm:$0xf]  ;;  %vm2310_vm10 = vnez %v2219_v56 }
 0x318   :  { %745 = vst [vmem:[#allocation2 + $0x4] sm:$0xff] %v1956_v41 }
 0x319   :  { %746 = vst [vmem:[#allocation2 + $0xc] sm:$0xff] %v1959_v49 }
 0x31f   :  { %v747_v8 = vld [vmem:[#allocation2] sm:$0xff] }
 0x320   :  { %v748_v10 = vld [vmem:[#allocation2 + $0x8] sm:$0xff]  ;;  %v749_v7 = vld [vmem:[#allocation2 + $0x10] sm:$0xf]  ;;  %753 = vst [vmem:[#allocation1] ss:$2 sm:$0xff] %v747_v8 }
 0x321   :  { %755 = vst [vmem:[#allocation1 + $0x10] ss:$2 sm:$0xff] %v748_v10  ;;  %v791_v42 = vld [vmem:[#allocation2 + $0x10] sm:$0xf] }
 0x322   :  { %757 = vst [vmem:[#allocation1 + $0x20] ss:$2 sm:$0xff] %v749_v7  ;;  %v845_v6 = vld [vmem:[#allocation2 + $0x10] sm:$0xf]  ;;  %v1014_v7 = vld [vmem:[#allocation2 + $0x14] sm:$0xf] }
 0x323   :  { %v887_v23 = vld [vmem:[#allocation2 + $0x10] sm:$0xf] }
 0x327   :  { %v1963_v58 = vld.sshfl [vmem:[#allocation1] sm:$0xff pattern:$0x75316420]  ;;  %v1965_v47 = vld.sshfl [vmem:[#allocation1 + $0x8] sm:$0xff pattern:$0x75316420] }
 0x328   :  { %v761_v48 = vld.sshfl [vmem:[#allocation1 + $0x18] sm:$0xff pattern:$0x75316420]  ;;  %v760_v52 = vld.sshfl [vmem:[#allocation1 + $0x10] sm:$0xff pattern:$0x75316420] }
 0x329   :  { %769 = vrot.lane.b32.xlu2 %v761_v48, %s1468_s1  ;;  %767 = vrot.lane.b32.xlu0 %v760_v52, %s1468_s1  ;;  %797 = vst [vmem:[#allocation1 + $0x10] ss:$2 sm:$0xff] %v748_v10  ;;  %v762_v53 = vld.sshfl [vmem:[#allocation1 + $0x20] sm:$0xff pattern:$0x75316420] }
 0x32a   :  { %799 = vst [vmem:[#allocation1 + $0x20] ss:$2 sm:$0xff] %v791_v42 }
 0x32b   :  { %795 = vst [vmem:[#allocation1] ss:$2 sm:$0xff] %v747_v8 }
 0x330   :  { %v803_v25 = vld.sshfl [vmem:[#allocation1 + $0x18] sm:$0xff pattern:$0x75316420]  ;;  %v802_v54 = vld.sshfl [vmem:[#allocation1 + $0x10] sm:$0xff pattern:$0x75316420] }
 0x331   :  { %v804_v3 = vld.sshfl [vmem:[#allocation1 + $0x20] sm:$0xff pattern:$0x75316420]  ;;  %771 = vrot.lane.b32.xlu0 %v762_v53, %s1468_s1  ;;  %811 = vrot.lane.b32.xlu2 %v803_v25, %s1469_s0  ;;  %851 = vst [vmem:[#allocation1 + $0x10] ss:$2 sm:$0xff] %v748_v10 }
 0x332   :  { %813 = vrot.lane.b32.xlu1 %v804_v3, %s1469_s0  ;;  %v801_v63 = vld.sshfl [vmem:[#allocation1 + $0x8] sm:$0xff pattern:$0x75316420]  ;;  %v800_v4 = vld.sshfl [vmem:[#allocation1] sm:$0xff pattern:$0x75316420] }
 0x333   :  { %849 = vst [vmem:[#allocation1] ss:$2 sm:$0xff] %v747_v8 }
 0x334   :  { %853 = vst [vmem:[#allocation1 + $0x20] ss:$2 sm:$0xff] %v845_v6 }
 0x338   :  { %v857_v17 = vld.sshfl [vmem:[#allocation1 + $0x18] sm:$0xff pattern:$0x75316420]  ;;  %v856_v22 = vld.sshfl [vmem:[#allocation1 + $0x10] sm:$0xff pattern:$0x75316420] }
 0x339   :  { %809 = vrot.lane.b32.xlu0 %v802_v54, %s1469_s0  ;;  %805 = vrot.lane.b32.xlu2 %v800_v4, %s1469_s0  ;;  %893 = vst [vmem:[#allocation1 + $0x10] ss:$2 sm:$0xff] %v748_v10  ;;  %v1056_v54 = vld [vmem:[#allocation2 + $0x14] sm:$0xf] }
 0x33a   :  { %807 = vrot.lane.b32.xlu1 %v801_v63, %s1469_s0  ;;  %v1975_v32 = vld.sshfl [vmem:[#allocation1 + $0x8] sm:$0xff pattern:$0x75316420]  ;;  %v854_v33 = vld.sshfl [vmem:[#allocation1] sm:$0xff pattern:$0x75316420] }
 0x33b   :  { %v858_v57 = vld.sshfl [vmem:[#allocation1 + $0x20] sm:$0xff pattern:$0x75316420]  ;;  %891 = vst [vmem:[#allocation1] ss:$2 sm:$0xff] %v747_v8 }
 0x33c   :  { %895 = vst [vmem:[#allocation1 + $0x20] ss:$2 sm:$0xff] %v887_v23 }
 0x340   :  { %v898_v38 = vld.sshfl [vmem:[#allocation1 + $0x10] sm:$0xff pattern:$0x75316420]  ;;  %v899_v9 = vld.sshfl [vmem:[#allocation1 + $0x18] sm:$0xff pattern:$0x75316420] }
 0x341   :  { %865 = vrot.lane.b32.xlu0 %v857_v17, %s1470_s14  ;;  %905 = vrot.lane.b32.xlu2 %v898_v38, %s1471_s15  ;;  %945 = vst [vmem:[#allocation1 + $0x10] ss:$2 sm:$0xff] %v1959_v49 }
 0x342   :  { %863 = vrot.lane.b32.xlu1 %v856_v22, %s1470_s14  ;;  %v897_v61 = vld.sshfl [vmem:[#allocation1 + $0x8] sm:$0xff pattern:$0x75316420]  ;;  %v896_v39 = vld.sshfl [vmem:[#allocation1] sm:$0xff pattern:$0x75316420] }
 0x343   :  { %v900_v14 = vld.sshfl [vmem:[#allocation1 + $0x20] sm:$0xff pattern:$0x75316420]  ;;  %943 = vst [vmem:[#allocation1] ss:$2 sm:$0xff] %v1956_v41 }
 0x344   :  { %968 = vst [vmem:[#allocation1 + $0x20] ss:$2 sm:$0xff] %v960_v59 }
 0x348   :  { %v948_v10 = vld.sshfl [vmem:[#allocation1 + $0x10] sm:$0xff pattern:$0x75316420]  ;;  %v949_v8 = vld.sshfl [vmem:[#allocation1 + $0x18] sm:$0xff pattern:$0x75316420] }
 0x349   :  { %867 = vrot.lane.b32.xlu0 %v858_v57, %s1470_s14  ;;  %909 = vrot.lane.b32.xlu2 %v900_v14, %s1471_s15  ;;  %966 = vst [vmem:[#allocation1 + $0x10] ss:$2 sm:$0xff] %v1959_v49  ;;  %v1110_v14 = vld [vmem:[#allocation2 + $0x14] sm:$0xf] }
 0x34a   :  { %907 = vrot.lane.b32.xlu1 %v899_v9, %s1471_s15  ;;  %v946_v42 = vld.sshfl [vmem:[#allocation1] sm:$0xff pattern:$0x75316420]  ;;  %v947_v48 = vld.sshfl [vmem:[#allocation1 + $0x8] sm:$0xff pattern:$0x75316420] }
 0x34b   :  { %v973_v52 = vld.sshfl [vmem:[#allocation1 + $0x20] sm:$0xff pattern:$0x75316420]  ;;  %964 = vst [vmem:[#allocation1] ss:$2 sm:$0xff] %v1956_v41 }
 0x34c   :  { %1022 = vst [vmem:[#allocation1 + $0x20] ss:$2 sm:$0xff] %v1014_v7 }
 0x34d   :  { %954 = vst [vmem:[#allocation3 + $0x8] sm:$0xf] %v946_v42 }
 0x34e   :  { %955 = vst [vmem:[#allocation3 + $0x88] sm:$0xf] %v947_v48 }
 0x34f   :  { %956 = vst [vmem:[#allocation3 + $0x28] sm:$0xf] %v948_v10 }
 0x350   :  { %v971_v53 = vld.sshfl [vmem:[#allocation1 + $0x10] sm:$0xff pattern:$0x75316420]  ;;  %957 = vst [vmem:[#allocation3 + $0x40] sm:$0xf] %v949_v8 }
 0x351   :  { %859 = vrot.lane.b32.xlu0 %v854_v33, %s1470_s14  ;;  %901 = vrot.lane.b32.xlu2 %v896_v39, %s1471_s15  ;;  %v972_v25 = vld.sshfl [vmem:[#allocation1 + $0x18] sm:$0xff pattern:$0x75316420] }
 0x352   :  { %903 = vrot.lane.b32.xlu1 %v897_v61, %s1471_s15  ;;  %v969_v3 = vld.sshfl [vmem:[#allocation1] sm:$0xff pattern:$0x75316420]  ;;  %1020 = vst [vmem:[#allocation1 + $0x10] ss:$2 sm:$0xff] %v1959_v49 }
 0x353   :  { %v1027_v63 = vld.sshfl [vmem:[#allocation1 + $0x20] sm:$0xff pattern:$0x75316420]  ;;  %v970_v4 = vld.sshfl [vmem:[#allocation1 + $0x8] sm:$0xff pattern:$0x75316420] }
 0x354   :  { %1064 = vst [vmem:[#allocation1 + $0x20] ss:$2 sm:$0xff] %v1056_v54 }
 0x355   :  { %1018 = vst [vmem:[#allocation1] ss:$2 sm:$0xff] %v1956_v41 }
 0x359   :  { %982 = vrot.lane.b32.xlu0 %v973_v52, %s1472_s16  ;;  %1036 = vrot.lane.b32.xlu2 %v1027_v63, %s1473_s17  ;;  %v1025_v6 = vld.sshfl [vmem:[#allocation1 + $0x10] sm:$0xff pattern:$0x75316420]  ;;  %v1026_v17 = vld.sshfl [vmem:[#allocation1 + $0x18] sm:$0xff pattern:$0x75316420] }
 0x35a   :  { %974 = vrot.lane.b32.xlu1 %v969_v3, %s1472_s16  ;;  %1062 = vst [vmem:[#allocation1 + $0x10] ss:$2 sm:$0xff] %v1959_v49 }
 0x35b   :  { %v1069_v33 = vld.sshfl [vmem:[#allocation1 + $0x20] sm:$0xff pattern:$0x75316420] }
 0x35c   :  { %v1024_v22 = vld.sshfl [vmem:[#allocation1 + $0x8] sm:$0xff pattern:$0x75316420]  ;;  %v1023_v23 = vld.sshfl [vmem:[#allocation1] sm:$0xff pattern:$0x75316420] }
 0x35d   :  { %1060 = vst [vmem:[#allocation1] ss:$2 sm:$0xff] %v1956_v41 }
 0x35e   :  { %1118 = vst [vmem:[#allocation1 + $0x20] ss:$2 sm:$0xff] %v1110_v14 }
 0x361   :  { %978 = vrot.lane.b32.xlu0 %v971_v53, %s1472_s16  ;;  %1034 = vrot.lane.b32.xlu2 %v1026_v17, %s1473_s17  ;;  %v1067_v57 = vld.sshfl [vmem:[#allocation1 + $0x10] sm:$0xff pattern:$0x75316420]  ;;  %v1068_v38 = vld.sshfl [vmem:[#allocation1 + $0x18] sm:$0xff pattern:$0x75316420] }
 0x362   :  { %1078 = vrot.lane.b32.xlu1 %v1069_v33, %s1474_s18  ;;  %1116 = vst [vmem:[#allocation1 + $0x10] ss:$2 sm:$0xff] %v1959_v49 }
 0x364   :  { %v1065_v9 = vld.sshfl [vmem:[#allocation1] sm:$0xff pattern:$0x75316420]  ;;  %v1066_v59 = vld.sshfl [vmem:[#allocation1 + $0x8] sm:$0xff pattern:$0x75316420] }
 0x365   :  { %1114 = vst [vmem:[#allocation1] ss:$2 sm:$0xff] %v1956_v41  ;;  %v1123_v41 = vld.sshfl [vmem:[#allocation1 + $0x20] sm:$0xff pattern:$0x75316420] }
 0x369   :  { %980 = vrot.lane.b32.xlu0 %v972_v25, %s1472_s16  ;;  %1028 = vrot.lane.b32.xlu2 %v1023_v23, %s1473_s17  ;;  %v1121_v61 = vld.sshfl [vmem:[#allocation1 + $0x10] sm:$0xff pattern:$0x75316420]  ;;  %v1122_v39 = vld.sshfl [vmem:[#allocation1 + $0x18] sm:$0xff pattern:$0x75316420] }
 0x36a   :  { %1030 = vrot.lane.b32.xlu1 %v1024_v22, %s1473_s17  ;;  %1332 = vst [vmem:[#allocation1 + $0x10] ss:$2 sm:$0xff] %v1535_v2 }
 0x36c   :  { %v1119_v10 = vld.sshfl [vmem:[#allocation1] sm:$0xff pattern:$0x75316420]  ;;  %v1120_v8 = vld.sshfl [vmem:[#allocation1 + $0x8] sm:$0xff pattern:$0x75316420] }
 0x36d   :  { %1330 = vst [vmem:[#allocation1] ss:$2 sm:$0xff] %v1530_v1 }
 0x371   :  { %976 = vrot.lane.b32.xlu0 %v970_v4, %s1472_s16  ;;  %1128 = vrot.lane.b32.xlu2 %v1121_v61, %s1475_s19 }
 0x372   :  { %1070 = vrot.lane.b32.xlu1 %v1065_v9, %s1474_s18 }
 0x379   :  { %1032 = vrot.lane.b32.xlu0 %v1025_v6, %s1473_s17  ;;  %1124 = vrot.lane.b32.xlu2 %v1119_v10, %s1475_s19 }
 0x37a   :  { %1130 = vrot.lane.b32.xlu1 %v1122_v39, %s1475_s19 }
 0x381   :  { %1074 = vrot.lane.b32.xlu0 %v1067_v57, %s1474_s18  ;;  %861 = vrot.lane.b32.xlu2 %v1975_v32, %s1470_s14 }
 0x382   :  { %1126 = vrot.lane.b32.xlu1 %v1120_v8, %s1475_s19 }
 0x383   :  { %v770_v1 = vpop.permute.xlu2 %769 }
 0x389   :  { %1076 = vrot.lane.b32.xlu0 %v1068_v38, %s1474_s18 }
 0x38a   :  { %763 = vrot.lane.b32.xlu1 %v1963_v58, %s1468_s1 }
 0x38b   :  { %v812_v2 = vpop.permute.xlu2 %811 }
 0x391   :  { %1132 = vrot.lane.b32.xlu0 %v1123_v41, %s1475_s19 }
 0x393   :  { %v806_v49 = vpop.permute.xlu2 %805 }
 0x399   :  { %1072 = vrot.lane.b32.xlu0 %v1066_v59, %s1474_s18 }
 0x39b   :  { %v2022_v7 = vpop.permute.xlu0 %767  ;;  %v906_v42 = vpop.permute.xlu2 %905 }
 0x39c   :  { %v775_v32 = vsel %vm2298_vm3, %v2022_v7, %v770_v1 }
 0x39d   :  { %v783_v48 = vsel %vm1627_vm4, %v775_v32, 0.0  ;;  %vm2301_vm4 = vmmov %vm2300_vm6 }
 0x39e   :  { %787 = vst [vmem:[#allocation3 + $0x50] sm:$0xf] %v783_v48  ;;  %vm2302_vm14 = vmmov %vm2301_vm4 }
 0x39f   :  { %vm2303_vm15 = vmmov %vm2301_vm4 }
 0x3a1   :  { %765 = vrot.lane.b32.xlu0 %v1965_v47, %s1468_s1 }
 0x3a3   :  { %v772_v58 = vpop.permute.xlu0 %771  ;;  %v910_v52 = vpop.permute.xlu2 %909 }
 0x3a4   :  { %v814_v53 = vpop.permute.xlu1 %813  ;;  %v776_v25 = vsel %vm2299_vm2, %v770_v1, %v772_v58  ;;  %vm2314_vm2 = vnez %v2213_v36 }
 0x3a5   :  { %v818_v54 = vsel %vm2300_vm6, %v812_v2, %v814_v53  ;;  %v784_v3 = vsel %vm1872_vm7, %v776_v25, 0.0  ;;  %vm2315_vm6 = vcmask 1039360  }
 0x3a6   :  { %v826_v63 = vsel %vm1654_vm8, %v818_v54, 0.0  ;;  %788 = vst [vmem:[#allocation3 + $0x18] sm:$0xf] %v784_v3  ;;  %vm2304_vm8 = vcmask 121856  }
 0x3a7   :  { %v834_v0 = vrot.slane %v826_v63, 4 }
 0x3a9   :  { %842 = vst [vmem:[#allocation3 + $0x18] sm:$0xf0] %v834_v0 }
 0x3ab   :  { %v810_v4 = vpop.permute.xlu0 %809  ;;  %v902_v6 = vpop.permute.xlu2 %901 }
 0x3ac   :  { %v817_v47 = vsel %vm2301_vm4, %v810_v4, %v812_v2  ;;  %v808_v17 = vpop.permute.xlu1 %807  ;;  %vm2316_vm4 = vmmov %vm2315_vm6 }
 0x3ad   :  { %v825_v22 = vsel %vm1658_vm9, %v817_v47, 0.0  ;;  %v815_v23 = vsel %vm2302_vm14, %v806_v49, %v808_v17  ;;  %v816_v33 = vsel %vm2303_vm15, %v808_v17, %v810_v4  ;;  %vm2306_vm9 = vcmask 924672  }
 0x3ae   :  { %v833_v43 = vrot.slane %v825_v22, 4  ;;  %v823_v11 = vsel %vm1828_vm5, %v815_v23, 0.0  ;;  %v824_v57 = vsel %vm1798_vm12, %v816_v33, 0.0  ;;  %vm2305_vm5 = vmmov %vm2304_vm8  ;;  %vm2307_vm12 = vcmask 7168  }
 0x3af   :  { %v831_v38 = vrot.slane %v823_v11, 4  ;;  %v832_v9 = vrot.slane %v824_v57, 4  ;;  %vm2308_vm7 = vmmov %vm2307_vm12 }
 0x3b0   :  { %841 = vst [vmem:[#allocation3 + $0x50] sm:$0xf0] %v833_v43  ;;  %vm2312_vm3 = vmmov %vm2308_vm7 }
 0x3b1   :  { %839 = vst [vmem:[#allocation3] sm:$0xf0] %v831_v38  ;;  %vm2317_vm14 = vmmov %vm2305_vm5 }
 0x3b2   :  { %840 = vst [vmem:[#allocation3 + $0x38] sm:$0xf0] %v832_v9  ;;  %vm2318_vm15 = vmmov %vm2305_vm5 }
 0x3b3   :  { %v866_v59 = vpop.permute.xlu0 %865  ;;  %v1037_v61 = vpop.permute.xlu2 %1036 }
 0x3b4   :  { %v864_v12 = vpop.permute.xlu1 %863 }
 0x3b5   :  { %v871_v39 = vsel %vm2304_vm8, %v864_v12, %v866_v59  ;;  %vm2319_vm8 = vnez %v2217_v40 }
 0x3b6   :  { %v879_v14 = vsel %vm1677_vm11, %v871_v39, 0.0  ;;  %vm2309_vm11 = vnez %v2215_v37 }
 0x3b7   :  { %883 = vst [vmem:[#allocation3 + $0x78] sm:$0xf] %v879_v14 }
 0x3bb   :  { %v868_v10 = vpop.permute.xlu0 %867  ;;  %v2048_v44 = vpop.permute.xlu2 %1034 }
 0x3bc   :  { %v872_v21 = vsel %vm2305_vm5, %v866_v59, %v868_v10  ;;  %v908_v8 = vpop.permute.xlu1 %907  ;;  %v1041_v1 = vsel %vm2306_vm9, %v2048_v44, %v1037_v61  ;;  %vm2320_vm5 = vnez %v2221_v60 }
 0x3bd   :  { %v880_v2 = vsel %vm1694_vm13, %v872_v21, 0.0  ;;  %v913_v41 = vsel %vm2307_vm12, %v906_v42, %v908_v8  ;;  %v914_v49 = vsel %vm2308_vm7, %v908_v8, %v910_v52  ;;  %v1049_v24 = vsel %vm1780_vm1, %v1041_v1, 0.0  ;;  %vm2311_vm13 = vmmov %vm2308_vm7 }
 0x3be   :  { %884 = vst [vmem:[#allocation3 + $0x80] sm:$0xf] %v880_v2  ;;  %v921_v32 = vsel %vm2309_vm11, %v913_v41, 0.0  ;;  %v922_v48 = vsel %vm2310_vm10, %v914_v49, 0.0  ;;  %vm2313_vm1 = vnez %v2223_v20  ;;  %vm2321_vm12 = vnez %v2273_v26  ;;  %vm2324_vm10 = vmmov %vm2316_vm4 }
 0x3bf   :  { %v929_v58 = vrot.slane %v921_v32, 4  ;;  %v930_v53 = vrot.slane %v922_v48, 4  ;;  %1053 = vst [vmem:[#allocation3 + $0x60] sm:$0xf] %v1049_v24  ;;  %vm2322_vm7 = vnez %v2238_v19  ;;  %vm2323_vm11 = vnez %v2275_v15 }
 0x3c1   :  { %937 = vst [vmem:[#allocation3 + $0x78] sm:$0xf0] %v929_v58 }
 0x3c2   :  { %938 = vst [vmem:[#allocation3 + $0x80] sm:$0xf0] %v930_v53 }
 0x3c3   :  { %v860_v35 = vpop.permute.xlu0 %859  ;;  %v1029_v25 = vpop.permute.xlu2 %1028 }
 0x3c4   :  { %v904_v54 = vpop.permute.xlu1 %903 }
 0x3c5   :  { %v911_v52 = vsel %vm2311_vm13, %v902_v6, %v904_v54  ;;  %v912_v51 = vsel %vm2312_vm3, %v904_v54, %v906_v42  ;;  %vm2325_vm13 = vmmov %vm2316_vm4  ;;  %vm2326_vm3 = vnez %v2225_v29 }
 0x3c6   :  { %v919_v3 = vsel %vm2313_vm1, %v911_v52, 0.0  ;;  %v920_v37 = vsel %vm2314_vm2, %v912_v51, 0.0  ;;  %vm2327_vm1 = vnez %v2227_v30  ;;  %vm2328_vm2 = vmmov %vm2306_vm9 }
 0x3c7   :  { %v927_v56 = vrot.slane %v919_v3, 4  ;;  %v928_v63 = vrot.slane %v920_v37, 4 }
 0x3c9   :  { %935 = vst [vmem:[#allocation3 + $0x30] sm:$0xf0] %v927_v56 }
 0x3ca   :  { %936 = vst [vmem:[#allocation3 + $0x68] sm:$0xf0] %v928_v63 }
 0x3cb   :  { %v983_v0 = vpop.permute.xlu0 %982  ;;  %v1129_v4 = vpop.permute.xlu2 %1128 }
 0x3cc   :  { %v975_v47 = vpop.permute.xlu1 %974 }
 0x3d3   :  { %v979_v17 = vpop.permute.xlu0 %978  ;;  %v1125_v22 = vpop.permute.xlu2 %1124 }
 0x3d4   :  { %v1079_v23 = vpop.permute.xlu1 %1078 }
 0x3db   :  { %v981_v33 = vpop.permute.xlu0 %980  ;;  %v862_v6 = vpop.permute.xlu2 %861 }
 0x3dc   :  { %v986_v42 = vsel %vm2315_vm6, %v979_v17, %v981_v33  ;;  %v987_v20 = vsel %vm2316_vm4, %v981_v33, %v983_v0  ;;  %v1031_v43 = vpop.permute.xlu1 %1030  ;;  %v869_v36 = vsel %vm2317_vm14, %v860_v35, %v862_v6  ;;  %v870_v11 = vsel %vm2318_vm15, %v862_v6, %v864_v12  ;;  %vm2329_vm6 = vmmov %vm2328_vm2  ;;  %v1152_v6 = vld [vmem:[#allocation3 + $0x50] sm:$0xff] }
 0x3dd   :  { %v994_v57 = vsel %vm2319_vm8, %v986_v42, 0.0  ;;  %v995_v38 = vsel %vm2320_vm5, %v987_v20, 0.0  ;;  %v1038_v9 = vsel %vm2306_vm9, %v1029_v25, %v1031_v43  ;;  %v877_v59 = vsel %vm2321_vm12, %v869_v36, 0.0 }
 0x3de   :  { %v1002_v61 = vrot.slane %v994_v57, 4  ;;  %v1003_v39 = vrot.slane %v995_v38, 4  ;;  %v1046_v14 = vsel %vm2322_vm7, %v1038_v9, 0.0  ;;  %881 = vst [vmem:[#allocation3 + $0x30] sm:$0xf] %v877_v59  ;;  %v878_v12 = vsel %vm2323_vm11, %v870_v11, 0.0 }
 0x3df   :  { %1050 = vst [vmem:[#allocation3 + $0x58] sm:$0xf] %v1046_v14  ;;  %vm2330_vm4 = vnez %v2231_v45  ;;  %vm2331_vm14 = vnez %v2233_v50  ;;  %vm2332_vm15 = vcmask 908288   ;;  %vm2333_vm8 = vnez %v2261_v27  ;;  %v1157_v38 = vld [vmem:[#allocation3 + $0x80] sm:$0xff] }
 0x3e0   :  { %1010 = vst [vmem:[#allocation3 + $0x28] sm:$0xf0] %v1002_v61  ;;  %vm2334_vm5 = vmmov %vm2332_vm15  ;;  %vm2336_vm12 = vnez %v2270_v28  ;;  %vm2337_vm7 = vnez %v2253_v55  ;;  %vm2338_vm11 = vcmask 1043456  }
 0x3e1   :  { %1011 = vst [vmem:[#allocation3 + $0x40] sm:$0xf0] %v1003_v39  ;;  %vm2335_vm9 = vmmov %vm2334_vm5  ;;  %v1153_v39 = vld [vmem:[#allocation3 + $0x18] sm:$0xff] }
 0x3e2   :  { %882 = vst [vmem:[#allocation3 + $0x68] sm:$0xf] %v878_v12 }
 0x3e3   :  { %v977_v40 = vpop.permute.xlu0 %976 }
 0x3e4   :  { %v984_v60 = vsel %vm2324_vm10, %v975_v47, %v977_v40  ;;  %v985_v10 = vsel %vm2325_vm13, %v977_v40, %v979_v17  ;;  %v1071_v26 = vpop.permute.xlu1 %1070  ;;  %vm2339_vm10 = vcmask 916480   ;;  %v1156_v47 = vld [vmem:[#allocation3 + $0x78] sm:$0xff] }
 0x3e5   :  { %v992_v21 = vsel %vm2326_vm3, %v984_v60, 0.0  ;;  %v993_v19 = vsel %vm2327_vm1, %v985_v10, 0.0  ;;  %vm2340_vm13 = vmmov %vm2339_vm10  ;;  %vm2341_vm3 = vnez %v2244_v31  ;;  %vm2342_vm1 = vnez %v2246_v18  ;;  %v1154_v60 = vld [vmem:[#allocation3 + $0x30] sm:$0xff] }
 0x3e6   :  { %v1000_v8 = vrot.slane %v992_v21, 4  ;;  %v1001_v1 = vrot.slane %v993_v19, 4 }
 0x3e7   :  { %v1160_v18 = vld [vmem:[#allocation3 + $0x28] sm:$0xff] }
 0x3e8   :  { %1008 = vst [vmem:[#allocation3 + $0x8] sm:$0xf0] %v1000_v8  ;;  %v1161_v11 = vld [vmem:[#allocation3 + $0x40] sm:$0xff] }
 0x3e9   :  { %1009 = vst [vmem:[#allocation3 + $0x88] sm:$0xf0] %v1001_v1  ;;  %v1155_v62 = vld [vmem:[#allocation3 + $0x68] sm:$0xff] }
 0x3eb   :  { %v1033_v15 = vpop.permute.xlu0 %1032 }
 0x3ec   :  { %v1039_v2 = vsel %vm2328_vm2, %v1031_v43, %v1033_v15  ;;  %v1040_v41 = vsel %vm2329_vm6, %v1033_v15, %v2048_v44  ;;  %v1131_v49 = vpop.permute.xlu1 %1130  ;;  %vm2343_vm2 = vmmov %vm2338_vm11 }
 0x3ed   :  { %v1047_v24 = vsel %vm2330_vm4, %v1039_v2, 0.0  ;;  %v1048_v29 = vsel %vm2331_vm14, %v1040_v41, 0.0  ;;  %v1136_v30 = vsel %vm2332_vm15, %v1129_v4, %v1131_v49  ;;  %vm2344_vm6 = vmmov %vm2343_vm2  ;;  %vm2346_vm14 = vnez %v2263_v34 }
 0x3ee   :  { %1051 = vst [vmem:[#allocation3 + $0x10] sm:$0xf] %v1047_v24  ;;  %v1144_v32 = vsel %vm2333_vm8, %v1136_v30, 0.0  ;;  %vm2345_vm4 = vmmov %vm2334_vm5 }
 0x3ef   :  { %1052 = vst [vmem:[#allocation3 + $0x98] sm:$0xf] %v1048_v29  ;;  %vm2347_vm15 = vmmov %vm2339_vm10  ;;  %v1158_v40 = vld [vmem:[#allocation3 + $0x8] sm:$0xff] }
 0x3f0   :  { %1148 = vst [vmem:[#allocation3 + $0x70] sm:$0xf] %v1144_v32  ;;  %vm2348_vm8 = vmmov %vm2339_vm10 }
 0x3f3   :  { %v1075_v48 = vpop.permute.xlu0 %1074 }
 0x3f4   :  { %v1127_v58 = vpop.permute.xlu1 %1126 }
 0x3f5   :  { %v1134_v53 = vsel %vm2334_vm5, %v1125_v22, %v1127_v58  ;;  %v1135_v44 = vsel %vm2335_vm9, %v1127_v58, %v1129_v4  ;;  %vm2349_vm5 = vnez %v2255_v13  ;;  %vm2350_vm9 = vnez %v2257_v16 }
 0x3f6   :  { %v1142_v45 = vsel %vm2336_vm12, %v1134_v53, 0.0  ;;  %v1143_v50 = vsel %vm2337_vm7, %v1135_v44, 0.0  ;;  %vm2351_vm12 = vmmov %vm2343_vm2  ;;  %vm2352_vm7 = vcmask 293888  }
 0x3f7   :  { %1146 = vst [vmem:[#allocation3 + $0x20] sm:$0xf] %v1142_v45  ;;  %v1168_v35 = vld [vmem:[#allocation3 + $0x70] sm:$0xf] }
 0x3f8   :  { %1147 = vst [vmem:[#allocation3 + $0x48] sm:$0xf] %v1143_v50  ;;  %1390 = vmatpush.msk.msrb.mxu2 %vm2338_vm11, %v1168_v35  ;;  %vm2353_vm11 = vcmask 138240  }
 0x3fb   :  { %v1077_v27 = vpop.permute.xlu0 %1076 }
 0x3fc   :  { %v1082_v25 = vsel %vm2339_vm10, %v1075_v48, %v1077_v27  ;;  %v1083_v54 = vsel %vm2340_vm13, %v1077_v27, %v1079_v23  ;;  %v1170_v23 = vld [vmem:[%s2165_s5] sm:$0xf]  ;;  %v764_v13 = vpop.permute.xlu1 %763  ;;  %vm2354_vm10 = vmmov %vm2353_vm11  ;;  %vm2355_vm13 = vnez %v2279_v46 }
 0x3fd   :  { %v1090_v52 = vsel %vm2341_vm3, %v1082_v25, 0.0  ;;  %v1091_v28 = vsel %vm2342_vm1, %v1083_v54, 0.0  ;;  %vm2356_vm3 = vmmov %vm2352_vm7 }
 0x3fe   :  { %v1098_v51 = vrot.slane %v1090_v52, 4  ;;  %v1099_v3 = vrot.slane %v1091_v28, 4  ;;  %v1166_v55 = vld [vmem:[#allocation3 + $0x20] sm:$0xf] }
 0x3ff   :  { %1386 = vmatpush.msk.msrb.mxu0 %vm2343_vm2, %v1166_v55  ;;  %v1167_v37 = vld [vmem:[#allocation3 + $0x48] sm:$0xf] }
 0x400   :  { %1106 = vst [vmem:[#allocation3 + $0x98] sm:$0xf0] %v1098_v51  ;;  %1388 = vmatpush.msk.msrb.mxu1 %vm2344_vm6, %v1167_v37  ;;  %vm2359_vm6 = vmmov %vm2343_vm2 }
 0x401   :  { %1107 = vst [vmem:[#allocation3 + $0x60] sm:$0xf0] %v1099_v3 }
 0x403   :  { %v1133_v56 = vpop.permute.xlu0 %1132 }
 0x404   :  { %v1137_v63 = vsel %vm2345_vm4, %v1131_v49, %v1133_v56  ;;  %vm2360_vm4 = vmmov %vm2343_vm2 }
 0x405   :  { %v1145_v31 = vsel %vm2346_vm14, %v1137_v63, 0.0  ;;  %vm2361_vm14 = vmmov %vm2343_vm2 }
 0x406   :  { %1149 = vst [vmem:[#allocation3 + $0x90] sm:$0xf] %v1145_v31 }
 0x407   :  { %v1164_v0 = vld [vmem:[#allocation3 + $0x98] sm:$0xff] }
 0x408   :  { %1238 = vmatpush.msrb.mxu2 %v1164_v0  ;;  %v1165_v36 = vld [vmem:[#allocation3 + $0x60] sm:$0xff] }
 0x40a   :  { %1239 = vmatpush.msrb.mxu2 %v1160_v18 }
 0x40b   :  { %v1073_v4 = vpop.permute.xlu0 %1072 }
 0x40c   :  { %v1080_v17 = vsel %vm2347_vm15, %v1071_v26, %v1073_v4  ;;  %v1081_v22 = vsel %vm2348_vm8, %v1073_v4, %v1075_v48  ;;  %1240 = vmatpush.msrb.mxu2 %v1156_v47  ;;  %vm2362_vm15 = vmmov %vm2343_vm2 }
 0x40d   :  { %v1088_v34 = vsel %vm2349_vm5, %v1080_v17, 0.0  ;;  %v1089_v33 = vsel %vm2350_vm9, %v1081_v22, 0.0  ;;  %v1169_v42 = vld [vmem:[#allocation3 + $0x90] sm:$0xf]  ;;  %vm2363_vm8 = vmmov %vm2343_vm2  ;;  %v1294_v17 = vld [vmem:[%s2166_s6] sm:$0xf] }
 0x40e   :  { %v1096_v20 = vrot.slane %v1088_v34, 4  ;;  %v1097_v43 = vrot.slane %v1089_v33, 4  ;;  %1241 = vmatpush.msrb.mxu2 %v1152_v6  ;;  %1392 = vmatpush.msk.msrb.mxu3 %vm2351_vm12, %v1169_v42  ;;  %vm2364_vm5 = vmmov %vm2343_vm2  ;;  %s1478_s6 = smov [#allocation7]  }
 0x40f   :  { %1391 = vmatmul.msk.f32.vlgmr.msrb.gmra.mxu2 %vm2352_vm7, %v1170_v23  ;;  %vm2365_vm9 = vmmov %vm2343_vm2 }
 0x410   :  { %1104 = vst [vmem:[#allocation3 + $0x58] sm:$0xf0] %v1096_v20  ;;  %1258 = vmatpush.msrb.mxu3 %v1165_v36 }
 0x411   :  { %1105 = vst [vmem:[#allocation3 + $0x10] sm:$0xf0] %v1097_v43 }
 0x412   :  { %1259 = vmatpush.msrb.mxu3 %v1161_v11 }
 0x413   :  { %v766_v57 = vpop.permute.xlu0 %765 }
 0x414   :  { %v773_v16 = vsel %vm2353_vm11, %v764_v13, %v766_v57  ;;  %v774_v9 = vsel %vm2354_vm10, %v766_v57, %v2022_v7  ;;  %1260 = vmatpush.msrb.mxu3 %v1157_v38  ;;  %v1159_v7 = vld [vmem:[#allocation3 + $0x88] sm:$0xff]  ;;  %v1333_v13 = vld.sshfl [vmem:[#allocation1] sm:$0xff pattern:$0x75316420]  ;;  %vm2366_vm10 = vmmov %vm2343_vm2 }
 0x415   :  { %v781_v59 = vsel %vm1916_vm0, %v773_v16, 0.0  ;;  %v782_v61 = vsel %vm2355_vm13, %v774_v9, 0.0  ;;  %vm2357_vm0 = vmmov %vm2356_vm3  ;;  %v1334_v57 = vld.sshfl [vmem:[#allocation1 + $0x8] sm:$0xff pattern:$0x75316420] }
 0x416   :  { %785 = vst [vmem:[#allocation3] sm:$0xf] %v781_v59  ;;  %1261 = vmatpush.msrb.mxu3 %v1153_v39  ;;  %vm2358_vm1 = vmmov %vm2357_vm0  ;;  %v1335_v38 = vld.sshfl [vmem:[#allocation1 + $0x10] sm:$0xff pattern:$0x75316420] }
 0x417   :  { %786 = vst [vmem:[#allocation3 + $0x38] sm:$0xf] %v782_v61  ;;  %v1162_v14 = vld [vmem:[#allocation3 + $0x58] sm:$0xff]  ;;  %1393 = vmatmul.msk.f32.vlgmr.msrb.gmra.mxu3 %vm2356_vm3, %v1170_v23  ;;  %vm2367_vm13 = vmmov %vm2343_vm2 }
 0x418   :  { %1198 = vmatpush.msrb.mxu0 %v1162_v14  ;;  %v1163_v12 = vld [vmem:[#allocation3 + $0x10] sm:$0xff]  ;;  %v1336_v16 = vld.sshfl [vmem:[#allocation1 + $0x18] sm:$0xff pattern:$0x75316420] }
 0x419   :  { %1218 = vmatpush.msrb.mxu1 %v1163_v12 }
 0x41a   :  { %1199 = vmatpush.msrb.mxu0 %v1158_v40 }
 0x41b   :  { %1219 = vmatpush.msrb.mxu1 %v1159_v7 }
 0x41c   :  { %1200 = vmatpush.msrb.mxu0 %v1154_v60 }
 0x41d   :  { %1220 = vmatpush.msrb.mxu1 %v1155_v62  ;;  %v1150_v46 = vld [vmem:[#allocation3] sm:$0xff] }
 0x41e   :  { %1201 = vmatpush.msrb.mxu0 %v1150_v46  ;;  %v1151_v10 = vld [vmem:[#allocation3 + $0x38] sm:$0xff] }
 0x41f   :  { %1221 = vmatpush.msrb.mxu1 %v1151_v10  ;;  %1387 = vmatmul.msk.f32.vlgmr.msrb.gmra.mxu0 %vm2357_vm0, %v1170_v23 }
 0x420   :  { %1389 = vmatmul.msk.f32.vlgmr.msrb.gmra.mxu1 %vm2358_vm1, %v1170_v23 }
 0x492   :  { %v1243_v26 = vpop.f32.mrf.mxu2 }
 0x493   :  { %v1269_v2 = vsel %vm2360_vm4, %v1243_v26, 0.0 }
 0x49a   :  { %v1263_v1 = vpop.f32.mrf.mxu3 }
 0x49b   :  { %v1271_v49 = vsel %vm2361_vm14, %v1263_v1, 0.0 }
 0x49c   :  { %v1203_v21 = vpop.f32.mrf.mxu0 }
 0x49d   :  { %v1266_v19 = vsel %vm2343_vm2, %v1203_v21, 0.0  ;;  %v1223_v8 = vpop.f32.mrf.mxu1 }
 0x49e   :  { %v1267_v15 = vsel %vm2359_vm6, %v1223_v8, 0.0 }
 0x49f   :  { %v1268_v41 = vadd.f32 %v1267_v15, %v1266_v19 }
 0x4a1   :  { %v1270_v24 = vadd.f32 %v1269_v2, %v1268_v41 }
 0x4a3   :  { %v1272_v29 = vadd.f32 %v1271_v49, %v1270_v24 }
 0x4a5   :  { %1273 = vadd.xlane.f32.xlu2 %v1272_v29 }
 0x518   :  { %v1274_v30 = vpop.xlane.xlu2 %1273 }
 0x519   :  { %v1275_v32 = vmul.f32 %v1274_v30, %v1939_v5 }
 0x51b   :  { %v1276_v48 = vsub.f32 %v1203_v21, %v1275_v32  ;;  %v1277_v58 = vsub.f32 %v1223_v8, %v1275_v32  ;;  %v1278_v53 = vsub.f32 %v1243_v26, %v1275_v32  ;;  %v1279_v44 = vsub.f32 %v1263_v1, %v1275_v32 }
 0x51d   :  { %v1280_v45 = vmul.f32 %v1276_v48, %v1276_v48  ;;  %v1281_v50 = vmul.f32 %v1277_v58, %v1277_v58  ;;  %v1282_v35 = vmul.f32 %v1278_v53, %v1278_v53  ;;  %v1283_v27 = vmul.f32 %v1279_v44, %v1279_v44 }
 0x51f   :  { %v1284_v25 = vsel %vm2362_vm15, %v1280_v45, 0.0  ;;  %v1285_v54 = vsel %vm2363_vm8, %v1281_v50, 0.0  ;;  %v1287_v28 = vsel %vm2364_vm5, %v1282_v35, 0.0  ;;  %v1289_v3 = vsel %vm2365_vm9, %v1283_v27, 0.0 }
 0x520   :  { %v1286_v52 = vadd.f32 %v1285_v54, %v1284_v25 }
 0x522   :  { %v1288_v51 = vadd.f32 %v1287_v28, %v1286_v52 }
 0x524   :  { %v1290_v55 = vadd.f32 %v1289_v3, %v1288_v51 }
 0x526   :  { %1291 = vadd.xlane.f32.xlu1 %v1290_v55 }
 0x599   :  { %v1292_v37 = vpop.xlane.xlu1 %1291 }
 0x59a   :  { %v1293_v56 = vmul.f32 %v1292_v37, %v1939_v5  ;;  %v1307_v5 = vld [vmem:[%s2167_s7] sm:$0xf]  ;;  %s1366_s7 = sshll.u32 %s1478_s6, 4  ;;  %s1367_s7 = int_to_ptr.vmem [resolvable:$true] %s1366_s7 }
 0x59c   :  { %v1295_v63 = vadd.f32 1e-05, %v1293_v56 }
 0x59e   :  { %1412 = vrsqrt.f32 %v1295_v63  ;;  %vm1302_vm7 = vweird.f32 %v1295_v63 }
 0x5a4   :  { %v1413_v31 = vpop.eup %1412 }
 0x5a5   :  { %v1297_v0 = vmul.f32 %v1413_v31, %v1295_v63  ;;  %vm1303_vm12 = vweird.f32 %v1413_v31 }
 0x5a6   :  { %vm1304_vm11 = vmor %vm1302_vm7, %vm1303_vm12 }
 0x5a7   :  { %v1298_v18 = vmul.f32 %v1413_v31, %v1297_v0 }
 0x5a9   :  { %v1299_v4 = vmul.f32 0.5, %v1298_v18 }
 0x5ab   :  { %v1300_v47 = vsub.f32 1.5, %v1299_v4 }
 0x5ad   :  { %v1301_v22 = vmul.f32 %v1413_v31, %v1300_v47 }
 0x5af   :  { %v1305_v23 = vsel %vm1304_vm11, %v1413_v31, %v1301_v22 }
 0x5b0   :  { %v1306_v34 = vmul.f32 %v1305_v23, %v1294_v17 }
 0x5b2   :  { %1312 = vperm.xlu0 %1407, %v1306_v34   ;;  %v1308_v33 = vmul.f32 %v1306_v34, %v1275_v32 }
 0x5b4   :  { %v1309_v6 = vsub.f32 %v1307_v5, %v1308_v33 }
 0x5ba   :  { %1321 = vperm.xlu0 %1407, %v1309_v6  }
 0x624   :  { %v1313_v42 = vpop.permute.xlu0 %1312 }
 0x625   :  { %v1315_v20 = vmul.f32 %v1313_v42, %v1203_v21  ;;  %v1316_v43 = vmul.f32 %v1313_v42, %v1223_v8  ;;  %v1317_v36 = vmul.f32 %v1313_v42, %v1243_v26  ;;  %v1318_v11 = vmul.f32 %v1313_v42, %v1263_v1 }
 0x62c   :  { %v1322_v9 = vpop.permute.xlu0 %1321 }
 0x62d   :  { %v1324_v59 = vadd.f32 %v1322_v9, %v1315_v20  ;;  %v1325_v61 = vadd.f32 %v1322_v9, %v1316_v43  ;;  %v1326_v39 = vadd.f32 %v1322_v9, %v1317_v36  ;;  %v1327_v14 = vadd.f32 %v1322_v9, %v1318_v11 }
 0x62f   :  { %v1341_v12 = vadd.f32 %v1333_v13, %v1324_v59  ;;  %v1342_v40 = vadd.f32 %v1334_v57, %v1325_v61  ;;  %v1343_v7 = vadd.f32 %v1335_v38, %v1326_v39  ;;  %v1344_v60 = vadd.f32 %v1336_v16, %v1327_v14 }
 0x631   :  { %v1346_v62 = vmax.f32 %v1342_v40, 0.0  ;;  %v1348_v46 = vmax.f32 %v1344_v60, 0.0  ;;  %v1345_v10 = vmax.f32 %v1341_v12, 0.0  ;;  %v1347_v26 = vmax.f32 %v1343_v7, 0.0 }
 0x633   :  { %v1353_v21 = vrot.slane %v1346_v62, 4  ;;  %v1354_v19 = vrot.slane %v1348_v46, 4 }
 0x635   :  { %v1355_v8 = vsel %vm2366_vm10, %v1345_v10, %v1353_v21  ;;  %v1356_v1 = vsel %vm2367_vm13, %v1347_v26, %v1354_v19 }
 0x636   :  { %1359 = vst [vmem:[#allocation7] sm:$0xff] %v1355_v8 }
 0x637   :  { %1360 = vst [vmem:[#allocation7 + $0x8] sm:$0xff] %v1356_v1 }
 0x638   :  { %1371 = dma.vmem_to_hbm [thread:$0]  %s1367_s7, 256, %s1369_s30, [#allocation6]  }
 0x639   :  { %1464 = dma.done.wait [#allocation6], 256  }
 0x63a   :  { %1465 = vsyncadd [#allocation6], 4294967040 }
 0x63b   :  { %1376 = vsyncpa [#allocation5], 1 }
 0x63c   :  { %1377 = vsyncpa [#allocation6], 1 }

</bundles_post_ra>
